<compile_context>
chip_gen: v5e
topology: v5e:2x2
jax: 0.10.0
libtpu: 0.0.40
codegen_flags: <defaults>
</compile_context>

<pallas_src>
import functools

import jax
import jax.numpy as jnp
from jax.experimental import pallas as pl
from jax.experimental.pallas import tpu as pltpu


def _round_up(x: int, m: int) -> int:
    return (x + m - 1) // m * m


# ---------------------------------------------------------------------------
# Fused kernel: the whole MLP over one batch tile per grid step.
# ---------------------------------------------------------------------------
def _mlp_kernel(*refs, num_layers, compute_dtype, precision):
    """refs = (x_ref, w0, b0, w1, b1, ..., w_{L-1}, b_{L-1}, o_ref)

      x_ref : (tm, K0_pad)        activation tile, already in compute_dtype
      w_l   : (K_l_pad, N_l_pad)  full (padded) weight of layer l, compute_dtype
      b_l   : (1, N_l_pad)        full (padded) bias of layer l, f32
      o_ref : (tm, N_last_pad)    output tile
    """
    x_ref = refs[0]
    o_ref = refs[1 + 2 * num_layers]

    h = x_ref[...]  # no entry cast: x was cast once in HBM by the wrapper
    for l in range(num_layers):
        w_ref = refs[1 + 2 * l]
        b_ref = refs[2 + 2 * l]
        # MXU matmul, always f32 accumulate. precision=HIGHEST on the f32 path.
        acc = jnp.dot(
            h,
            w_ref[...],
            preferred_element_type=jnp.float32,
            precision=precision,
        )
        acc = acc + b_ref[...]  # (1, N) f32 bias broadcasts over the batch tile
        if l < num_layers - 1:
            acc = jnp.maximum(acc, 0.0)       # fused ReLU (f32 epilogue)
            h = acc.astype(compute_dtype)     # carry inter-layer act. narrow
        else:
            h = acc
    o_ref[...] = h.astype(o_ref.dtype)


# ---------------------------------------------------------------------------
# One-time parameter preparation (hoisted out of the per-call path).
# ---------------------------------------------------------------------------
def prepare_mlp_params(params, compute_dtype=jnp.bfloat16):
    """Pad (lane-dense, multiples of 128) and cast all weights/biases ONCE.

    params: list of (w, b) with w: (in, out), b: (out,)   [w = W_pytorch.T]
    """
    dims_in = [w.shape[0] for (w, _) in params]
    dims_out = [w.shape[1] for (w, _) in params]
    for l in range(len(params) - 1):
        assert dims_in[l + 1] == dims_out[l], "layer dims must chain"
    pad_in = [_round_up(d, 128) for d in dims_in]
    pad_out = [_round_up(d, 128) for d in dims_out]

    flat = []
    for l, (w, b) in enumerate(params):
        w_p = (
            jnp.zeros((pad_in[l], pad_out[l]), compute_dtype)
            .at[: w.shape[0], : w.shape[1]]
            .set(w.astype(compute_dtype))
        )
        b_p = (
            jnp.zeros((1, pad_out[l]), jnp.float32)
            .at[0, : b.shape[0]]
            .set(b.astype(jnp.float32))
        )
        flat.extend([w_p, b_p])

    return dict(
        flat=flat,
        dims_in=dims_in,
        dims_out=dims_out,
        pad_in=pad_in,
        pad_out=pad_out,
        compute_dtype=compute_dtype,
    )


def _device_defaults():
    """(block_m, vmem_limit_bytes) per TPU generation."""
    kind = ""
    try:
        kind = jax.devices()[0].device_kind.lower()
    except Exception:
        pass
    if "v7" in kind:
        # v7x: 64 MiB VMEM per TensorCore, 2 TCs/chip -> stay tight.
        return 256, 48 * 1024 * 1024
    if "v5" in kind or "v6" in kind:
        # v5e/v6e: 128 MiB VMEM -> bigger tiles, fewer grid steps.
        # (tm=128 already saturates v5e's 4x128x128 MXUs; larger tm only
        #  amortizes per-step overhead and improves DMA efficiency.)
        return 512, 96 * 1024 * 1024
    # Unknown / older generations: conservative.
    return 256, 32 * 1024 * 1024


# ---------------------------------------------------------------------------
# Forward: single pallas_call over a batch-tiled "parallel" grid.
# ---------------------------------------------------------------------------
def mlp_forward_fused(prepared, x, *, block_m=None, vmem_limit_bytes=None):
    M, K0 = x.shape
    dims_in, dims_out = prepared["dims_in"], prepared["dims_out"]
    pad_in, pad_out = prepared["pad_in"], prepared["pad_out"]
    compute_dtype = prepared["compute_dtype"]
    num_layers = len(dims_in)
    assert K0 == dims_in[0]

    dflt_bm, dflt_vmem = _device_defaults()
    if block_m is None:
        block_m = dflt_bm
    if vmem_limit_bytes is None:
        vmem_limit_bytes = dflt_vmem

    cdt_size = jnp.dtype(compute_dtype).itemsize
    out_dtype = x.dtype
    out_size = jnp.dtype(out_dtype).itemsize

    # Resident (single-buffered) weights + biases.
    weight_bytes = sum(pi * po for pi, po in zip(pad_in, pad_out)) * cdt_size
    bias_bytes = sum(pad_out) * 4
    resident_bytes = weight_bytes + bias_bytes
    # TODO(synk): if resident_bytes alone exceeds the VMEM budget (very wide
    # layers, esp. on v7x's 64 MiB/TC), stream the widest layer over N with an
    # inner pltpu.emit_pipeline instead of keeping it fully resident.

    # Per-row VMEM cost of a batch tile: double-buffered x and out tiles plus
    # headroom for the live f32 accumulator / activation between layers.
    per_row = (
        2 * pad_in[0] * cdt_size
        + 2 * pad_out[-1] * out_size
        + 3 * max(pad_out) * 4
    )

    # Tile size: biggest that fits, but >= 2 grid steps whenever M allows it so
    # v7x's 2 TensorCores both get work under the "parallel" batch axis.
    tm = min(block_m, _round_up(M, 8))
    if M > 8:
        tm = min(tm, _round_up(-(-M // 2), 8))
    budget = int(vmem_limit_bytes * 0.85) - resident_bytes
    while tm > 8 and tm * per_row > budget:
        tm = max(8, _round_up(tm // 2, 8))
    m_pad = _round_up(M, tm)

    # Pad + cast activations once in HBM (removes the per-tile in-kernel cast).
    x_p = (
        jnp.zeros((m_pad, pad_in[0]), compute_dtype)
        .at[:M, :K0]
        .set(x.astype(compute_dtype))
    )

    # True f32 matmul on the f32 path; default (fast bf16 MXU) otherwise.
    precision = (
        jax.lax.Precision.HIGHEST
        if jnp.dtype(compute_dtype) == jnp.dtype(jnp.float32)
        else None
    )
    kernel = functools.partial(
        _mlp_kernel,
        num_layers=num_layers,
        compute_dtype=compute_dtype,
        precision=precision,
    )

    flops = 2 * m_pad * sum(pi * po for pi, po in zip(pad_in, pad_out))
    bytes_accessed = (
        x_p.size * cdt_size + weight_bytes + bias_bytes
        + m_pad * pad_out[-1] * out_size
    )
    cost = pl.CostEstimate(
        flops=flops, transcendentals=0, bytes_accessed=bytes_accessed
    )

    def _build_and_call(single_buffer_weights: bool):
        in_specs = [pl.BlockSpec((tm, pad_in[0]), lambda i: (i, 0))]
        for l in range(num_layers):
            if single_buffer_weights:
                # Constant index_map -> resident across the batch grid;
                # single buffering halves weight VMEM vs. the default 2x.
                w_spec = pl.BlockSpec(
                    (pad_in[l], pad_out[l]), lambda i: (0, 0),
                    pipeline_mode=pl.Buffered(1),
                )
                b_spec = pl.BlockSpec(
                    (1, pad_out[l]), lambda i: (0, 0),
                    pipeline_mode=pl.Buffered(1),
                )
            else:
                w_spec = pl.BlockSpec((pad_in[l], pad_out[l]), lambda i: (0, 0))
                b_spec = pl.BlockSpec((1, pad_out[l]), lambda i: (0, 0))
            in_specs.extend([w_spec, b_spec])
        out_spec = pl.BlockSpec((tm, pad_out[-1]), lambda i: (i, 0))

        fn = pl.pallas_call(
            kernel,
            out_shape=jax.ShapeDtypeStruct((m_pad, pad_out[-1]), out_dtype),
            grid_spec=pltpu.PrefetchScalarGridSpec(
                num_scalar_prefetch=0,
                grid=(m_pad // tm,),
                in_specs=in_specs,
                out_specs=out_spec,
            ),
            compiler_params=pltpu.CompilerParams(
                # Batch tiles are independent -> parallel (v7x 2-TC sharding).
                dimension_semantics=("parallel",),
                vmem_limit_bytes=vmem_limit_bytes,
            ),
            cost_estimate=cost,
        )
        return jax.block_until_ready(fn(x_p, *prepared["flat"]))

    try:
        out_p = _build_and_call(True)
    except Exception:
        # pl.Buffered(1) unsupported on this jax version/backend ->
        # fall back to default double-buffering (correct, just more VMEM).
        out_p = _build_and_call(False)

    return out_p[:M, : dims_out[-1]]


# ---------------------------------------------------------------------------
# Param init mirroring nn.Linear (stored transposed) + pure-JAX reference.
# ---------------------------------------------------------------------------
def init_mlp_params(key, input_dim, hidden_dim, output_dim, num_layers):
    h = [hidden_dim] * (num_layers - 1)
    dims_in = [input_dim] + h
    dims_out = h + [output_dim]
    params = []
    for n_in, n_out in zip(dims_in, dims_out):
        key, kw, kb = jax.random.split(key, 3)
        bound = 1.0 / jnp.sqrt(n_in)
        # PyTorch Linear weight is (out, in); we keep (in, out) for x @ W.
        w = jax.random.uniform(kw, (n_in, n_out), jnp.float32, -bound, bound)
        b = jax.random.uniform(kb, (n_out,), jnp.float32, -bound, bound)
        params.append((w, b))
    return params


def mlp_reference(params, x):
    num_layers = len(params)
    for i, (w, b) in enumerate(params):
        x = x @ w + b
        if i < num_layers - 1:
            x = jnp.maximum(x, 0.0)
    return x


if __name__ == "__main__":
    key = jax.random.PRNGKey(0)

    # --- Small-shape check (matches the module's toy config) ----------------
    batch, input_dim, hidden_dim, output_dim, num_layers = 8, 32, 32, 16, 3
    key, kx, kp = jax.random.split(key, 3)
    x = jax.random.normal(kx, (batch, input_dim), jnp.float32)
    params = init_mlp_params(kp, input_dim, hidden_dim, output_dim, num_layers)
    ref = mlp_reference(params, x)

    # f32 compute path (Precision.HIGHEST in-kernel) -- tight tolerance.
    prep_f32 = prepare_mlp_params(params, compute_dtype=jnp.float32)
    out_f32 = mlp_forward_fused(prep_f32, x)
    assert out_f32.shape == (batch, output_dim)
    assert jnp.allclose(out_f32, ref, atol=1e-5, rtol=1e-5)

    # Default bf16 weight/activation path (f32 MXU accumulate) -- looser tol.
    prep_bf16 = prepare_mlp_params(params)  # compute_dtype=bfloat16 default
    out_bf16 = mlp_forward_fused(prep_bf16, x)
    assert out_bf16.shape == (batch, output_dim)
    assert jnp.allclose(out_bf16, ref, atol=5e-2, rtol=5e-2)

    # --- Multi-tile grid + non-aligned dims (exercises padding, >=2 steps) --
    batch2, in2, hid2, outd2, layers2 = 300, 96, 160, 48, 3
    key, kx2, kp2 = jax.random.split(key, 3)
    x2 = jax.random.normal(kx2, (batch2, in2), jnp.float32)
    params2 = init_mlp_params(kp2, in2, hid2, outd2, layers2)
    ref2 = mlp_reference(params2, x2)

    prep2_f32 = prepare_mlp_params(params2, compute_dtype=jnp.float32)
    out2 = mlp_forward_fused(prep2_f32, x2, block_m=128)
    assert out2.shape == (batch2, outd2)
    assert jnp.allclose(out2, ref2, atol=2e-2, rtol=2e-2)

    prep2_bf16 = prepare_mlp_params(params2)
    out2_bf16 = mlp_forward_fused(prep2_bf16, x2)
    assert jnp.allclose(out2_bf16, ref2, atol=1e-1, rtol=1e-1)

    print("KERNEL_OK")
</pallas_src>

<mosaic_0001>
module attributes {stable_mosaic.version = 11 : i64} {
  func.func @_mlp_kernel(%arg0: i32, %arg1: memref<8x128xf32, #tpu.memory_space<vmem>>, %arg2: memref<128x128xf32, #tpu.memory_space<vmem>>, %arg3: memref<1x128xf32, #tpu.memory_space<vmem>>, %arg4: memref<128x128xf32, #tpu.memory_space<vmem>>, %arg5: memref<1x128xf32, #tpu.memory_space<vmem>>, %arg6: memref<128x128xf32, #tpu.memory_space<vmem>>, %arg7: memref<1x128xf32, #tpu.memory_space<vmem>>, %arg8: memref<8x128xf32, #tpu.memory_space<vmem>>) attributes {dimension_semantics = [#tpu.dimension_semantics<parallel>], iteration_bounds = array<i64: 1>, scalar_prefetch = 0 : i64, scratch_operands = 0 : i64, tpu.core_type = #tpu.core_type<tc>, window_params = [{transform_indices = @transform_0, window_bounds = array<i64: 8, 128>}, {pipeline_mode = #tpu.pipeline_mode<synchronous>, transform_indices = @transform_1, window_bounds = array<i64: 128, 128>}, {pipeline_mode = #tpu.pipeline_mode<synchronous>, transform_indices = @transform_2, window_bounds = array<i64: 1, 128>}, {pipeline_mode = #tpu.pipeline_mode<synchronous>, transform_indices = @transform_3, window_bounds = array<i64: 128, 128>}, {pipeline_mode = #tpu.pipeline_mode<synchronous>, transform_indices = @transform_4, window_bounds = array<i64: 1, 128>}, {pipeline_mode = #tpu.pipeline_mode<synchronous>, transform_indices = @transform_5, window_bounds = array<i64: 128, 128>}, {pipeline_mode = #tpu.pipeline_mode<synchronous>, transform_indices = @transform_6, window_bounds = array<i64: 1, 128>}, {transform_indices = @transform_7, window_bounds = array<i64: 8, 128>}]} {
    %c0 = arith.constant 0 : index
    %c0_0 = arith.constant 0 : index
    %0 = vector.load %arg1[%c0, %c0_0] : memref<8x128xf32, #tpu.memory_space<vmem>>, vector<8x128xf32>
    %c0_1 = arith.constant 0 : index
    %c0_2 = arith.constant 0 : index
    %1 = vector.load %arg2[%c0_1, %c0_2] : memref<128x128xf32, #tpu.memory_space<vmem>>, vector<128x128xf32>
    %cst = arith.constant dense<0.000000e+00> : vector<8x128xf32>
    %2 = tpu.matmul %0, %1, %cst {dimension_numbers = #tpu.dot_dimension_numbers<[1], [0], [0], [1], [0, 0, 1, 1], [], []>, precision = #tpu.contract_precision<fp32>} : vector<8x128xf32>, vector<128x128xf32>, vector<8x128xf32> -> vector<8x128xf32>
    %c0_3 = arith.constant 0 : index
    %c0_4 = arith.constant 0 : index
    %3 = vector.load %arg3[%c0_3, %c0_4] : memref<1x128xf32, #tpu.memory_space<vmem>>, vector<1x128xf32>
    %4 = vector.broadcast %3 : vector<1x128xf32> to vector<8x128xf32>
    %5 = arith.addf %2, %4 : vector<8x128xf32>
    %cst_5 = arith.constant 0.000000e+00 : f32
    %6 = vector.broadcast %cst_5 : f32 to vector<8x128xf32>
    %7 = arith.maximumf %5, %6 : vector<8x128xf32>
    %c0_6 = arith.constant 0 : index
    %c0_7 = arith.constant 0 : index
    %8 = vector.load %arg4[%c0_6, %c0_7] : memref<128x128xf32, #tpu.memory_space<vmem>>, vector<128x128xf32>
    %cst_8 = arith.constant dense<0.000000e+00> : vector<8x128xf32>
    %9 = tpu.matmul %7, %8, %cst_8 {dimension_numbers = #tpu.dot_dimension_numbers<[1], [0], [0], [1], [0, 0, 1, 1], [], []>, precision = #tpu.contract_precision<fp32>} : vector<8x128xf32>, vector<128x128xf32>, vector<8x128xf32> -> vector<8x128xf32>
    %c0_9 = arith.constant 0 : index
    %c0_10 = arith.constant 0 : index
    %10 = vector.load %arg5[%c0_9, %c0_10] : memref<1x128xf32, #tpu.memory_space<vmem>>, vector<1x128xf32>
    %11 = vector.broadcast %10 : vector<1x128xf32> to vector<8x128xf32>
    %12 = arith.addf %9, %11 : vector<8x128xf32>
    %cst_11 = arith.constant 0.000000e+00 : f32
    %13 = vector.broadcast %cst_11 : f32 to vector<8x128xf32>
    %14 = arith.maximumf %12, %13 : vector<8x128xf32>
    %c0_12 = arith.constant 0 : index
    %c0_13 = arith.constant 0 : index
    %15 = vector.load %arg6[%c0_12, %c0_13] : memref<128x128xf32, #tpu.memory_space<vmem>>, vector<128x128xf32>
    %cst_14 = arith.constant dense<0.000000e+00> : vector<8x128xf32>
    %16 = tpu.matmul %14, %15, %cst_14 {dimension_numbers = #tpu.dot_dimension_numbers<[1], [0], [0], [1], [0, 0, 1, 1], [], []>, precision = #tpu.contract_precision<fp32>} : vector<8x128xf32>, vector<128x128xf32>, vector<8x128xf32> -> vector<8x128xf32>
    %c0_15 = arith.constant 0 : index
    %c0_16 = arith.constant 0 : index
    %17 = vector.load %arg7[%c0_15, %c0_16] : memref<1x128xf32, #tpu.memory_space<vmem>>, vector<1x128xf32>
    %18 = vector.broadcast %17 : vector<1x128xf32> to vector<8x128xf32>
    %19 = arith.addf %16, %18 : vector<8x128xf32>
    %c0_17 = arith.constant 0 : index
    %c0_18 = arith.constant 0 : index
    %20 = vector.load %arg8[%c0_17, %c0_18] : memref<8x128xf32, #tpu.memory_space<vmem>>, vector<8x128xf32>
    tpu.vector_store %arg8[%c0_17, %c0_18], %19 {strides = array<i32>} : memref<8x128xf32, #tpu.memory_space<vmem>>, vector<8x128xf32>,
    return
  }
  func.func @transform_0(%arg0: i32) -> (i32, i32) {
    %c0_i32 = arith.constant 0 : i32
    %c0_i32_0 = arith.constant 0 : i32
    return %arg0, %c0_i32 : i32, i32
  }
  func.func @transform_1(%arg0: i32) -> (i32, i32) {
    %c0_i32 = arith.constant 0 : i32
    %c0_i32_0 = arith.constant 0 : i32
    %c0_i32_1 = arith.constant 0 : i32
    return %c0_i32, %c0_i32_0 : i32, i32
  }
  func.func @transform_2(%arg0: i32) -> (i32, i32) {
    %c0_i32 = arith.constant 0 : i32
    %c0_i32_0 = arith.constant 0 : i32
    %c0_i32_1 = arith.constant 0 : i32
    return %c0_i32, %c0_i32_0 : i32, i32
  }
  func.func @transform_3(%arg0: i32) -> (i32, i32) {
    %c0_i32 = arith.constant 0 : i32
    %c0_i32_0 = arith.constant 0 : i32
    %c0_i32_1 = arith.constant 0 : i32
    return %c0_i32, %c0_i32_0 : i32, i32
  }
  func.func @transform_4(%arg0: i32) -> (i32, i32) {
    %c0_i32 = arith.constant 0 : i32
    %c0_i32_0 = arith.constant 0 : i32
    %c0_i32_1 = arith.constant 0 : i32
    return %c0_i32, %c0_i32_0 : i32, i32
  }
  func.func @transform_5(%arg0: i32) -> (i32, i32) {
    %c0_i32 = arith.constant 0 : i32
    %c0_i32_0 = arith.constant 0 : i32
    %c0_i32_1 = arith.constant 0 : i32
    return %c0_i32, %c0_i32_0 : i32, i32
  }
  func.func @transform_6(%arg0: i32) -> (i32, i32) {
    %c0_i32 = arith.constant 0 : i32
    %c0_i32_0 = arith.constant 0 : i32
    %c0_i32_1 = arith.constant 0 : i32
    return %c0_i32, %c0_i32_0 : i32, i32
  }
  func.func @transform_7(%arg0: i32) -> (i32, i32) {
    %c0_i32 = arith.constant 0 : i32
    %c0_i32_0 = arith.constant 0 : i32
    return %arg0, %c0_i32 : i32, i32
  }
}

module attributes {stable_mosaic.version = 11 : i64} {
  func.func @_mlp_kernel(%arg0: i32, %arg1: memref<8x128xf32, #tpu.memory_space<vmem>>, %arg2: memref<128x128xf32, #tpu.memory_space<vmem>>, %arg3: memref<1x128xf32, #tpu.memory_space<vmem>>, %arg4: memref<128x128xf32, #tpu.memory_space<vmem>>, %arg5: memref<1x128xf32, #tpu.memory_space<vmem>>, %arg6: memref<128x128xf32, #tpu.memory_space<vmem>>, %arg7: memref<1x128xf32, #tpu.memory_space<vmem>>, %arg8: memref<8x128xf32, #tpu.memory_space<vmem>>) attributes {dimension_semantics = [#tpu.dimension_semantics<parallel>], iteration_bounds = array<i64: 1>, scalar_prefetch = 0 : i64, scratch_operands = 0 : i64, tpu.core_type = #tpu.core_type<tc>, window_params = [{transform_indices = @transform_0, window_bounds = array<i64: 8, 128>}, {pipeline_mode = #tpu.pipeline_mode<synchronous>, transform_indices = @transform_1, window_bounds = array<i64: 128, 128>}, {pipeline_mode = #tpu.pipeline_mode<synchronous>, transform_indices = @transform_2, window_bounds = array<i64: 1, 128>}, {pipeline_mode = #tpu.pipeline_mode<synchronous>, transform_indices = @transform_3, window_bounds = array<i64: 128, 128>}, {pipeline_mode = #tpu.pipeline_mode<synchronous>, transform_indices = @transform_4, window_bounds = array<i64: 1, 128>}, {pipeline_mode = #tpu.pipeline_mode<synchronous>, transform_indices = @transform_5, window_bounds = array<i64: 128, 128>}, {pipeline_mode = #tpu.pipeline_mode<synchronous>, transform_indices = @transform_6, window_bounds = array<i64: 1, 128>}, {transform_indices = @transform_7, window_bounds = array<i64: 8, 128>}]} {
    %c0 = arith.constant 0 : index
    %c0_0 = arith.constant 0 : index
    %0 = vector.load %arg1[%c0, %c0_0] : memref<8x128xf32, #tpu.memory_space<vmem>>, vector<8x128xf32>
    %c0_1 = arith.constant 0 : index
    %c0_2 = arith.constant 0 : index
    %1 = vector.load %arg2[%c0_1, %c0_2] : memref<128x128xf32, #tpu.memory_space<vmem>>, vector<128x128xf32>
    %cst = arith.constant dense<0.000000e+00> : vector<8x128xf32>
    %2 = tpu.matmul %0, %1, %cst {dimension_numbers = #tpu.dot_dimension_numbers<[1], [0], [0], [1], [0, 0, 1, 1], [], []>, precision = #tpu.contract_precision<fp32>} : vector<8x128xf32>, vector<128x128xf32>, vector<8x128xf32> -> vector<8x128xf32>
    %c0_3 = arith.constant 0 : index
    %c0_4 = arith.constant 0 : index
    %3 = vector.load %arg3[%c0_3, %c0_4] : memref<1x128xf32, #tpu.memory_space<vmem>>, vector<1x128xf32>
    %4 = vector.broadcast %3 : vector<1x128xf32> to vector<8x128xf32>
    %5 = arith.addf %2, %4 : vector<8x128xf32>
    %cst_5 = arith.constant 0.000000e+00 : f32
    %6 = vector.broadcast %cst_5 : f32 to vector<8x128xf32>
    %7 = arith.maximumf %5, %6 : vector<8x128xf32>
    %c0_6 = arith.constant 0 : index
    %c0_7 = arith.constant 0 : index
    %8 = vector.load %arg4[%c0_6, %c0_7] : memref<128x128xf32, #tpu.memory_space<vmem>>, vector<128x128xf32>
    %cst_8 = arith.constant dense<0.000000e+00> : vector<8x128xf32>
    %9 = tpu.matmul %7, %8, %cst_8 {dimension_numbers = #tpu.dot_dimension_numbers<[1], [0], [0], [1], [0, 0, 1, 1], [], []>, precision = #tpu.contract_precision<fp32>} : vector<8x128xf32>, vector<128x128xf32>, vector<8x128xf32> -> vector<8x128xf32>
    %c0_9 = arith.constant 0 : index
    %c0_10 = arith.constant 0 : index
    %10 = vector.load %arg5[%c0_9, %c0_10] : memref<1x128xf32, #tpu.memory_space<vmem>>, vector<1x128xf32>
    %11 = vector.broadcast %10 : vector<1x128xf32> to vector<8x128xf32>
    %12 = arith.addf %9, %11 : vector<8x128xf32>
    %cst_11 = arith.constant 0.000000e+00 : f32
    %13 = vector.broadcast %cst_11 : f32 to vector<8x128xf32>
    %14 = arith.maximumf %12, %13 : vector<8x128xf32>
    %c0_12 = arith.constant 0 : index
    %c0_13 = arith.constant 0 : index
    %15 = vector.load %arg6[%c0_12, %c0_13] : memref<128x128xf32, #tpu.memory_space<vmem>>, vector<128x128xf32>
    %cst_14 = arith.constant dense<0.000000e+00> : vector<8x128xf32>
    %16 = tpu.matmul %14, %15, %cst_14 {dimension_numbers = #tpu.dot_dimension_numbers<[1], [0], [0], [1], [0, 0, 1, 1], [], []>, precision = #tpu.contract_precision<fp32>} : vector<8x128xf32>, vector<128x128xf32>, vector<8x128xf32> -> vector<8x128xf32>
    %c0_15 = arith.constant 0 : index
    %c0_16 = arith.constant 0 : index
    %17 = vector.load %arg7[%c0_15, %c0_16] : memref<1x128xf32, #tpu.memory_space<vmem>>, vector<1x128xf32>
    %18 = vector.broadcast %17 : vector<1x128xf32> to vector<8x128xf32>
    %19 = arith.addf %16, %18 : vector<8x128xf32>
    %c0_17 = arith.constant 0 : index
    %c0_18 = arith.constant 0 : index
    %20 = vector.load %arg8[%c0_17, %c0_18] : memref<8x128xf32, #tpu.memory_space<vmem>>, vector<8x128xf32>
    tpu.vector_store %arg8[%c0_17, %c0_18], %19 {strides = array<i32>} : memref<8x128xf32, #tpu.memory_space<vmem>>, vector<8x128xf32>,
    return
  }
  func.func @transform_0(%arg0: i32) -> (i32, i32) {
    %c0_i32 = arith.constant 0 : i32
    %c0_i32_0 = arith.constant 0 : i32
    return %arg0, %c0_i32 : i32, i32
  }
  func.func @transform_1(%arg0: i32) -> (i32, i32) {
    %c0_i32 = arith.constant 0 : i32
    %c0_i32_0 = arith.constant 0 : i32
    %c0_i32_1 = arith.constant 0 : i32
    return %c0_i32, %c0_i32_0 : i32, i32
  }
  func.func @transform_2(%arg0: i32) -> (i32, i32) {
    %c0_i32 = arith.constant 0 : i32
    %c0_i32_0 = arith.constant 0 : i32
    %c0_i32_1 = arith.constant 0 : i32
    return %c0_i32, %c0_i32_0 : i32, i32
  }
  func.func @transform_3(%arg0: i32) -> (i32, i32) {
    %c0_i32 = arith.constant 0 : i32
    %c0_i32_0 = arith.constant 0 : i32
    %c0_i32_1 = arith.constant 0 : i32
    return %c0_i32, %c0_i32_0 : i32, i32
  }
  func.func @transform_4(%arg0: i32) -> (i32, i32) {
    %c0_i32 = arith.constant 0 : i32
    %c0_i32_0 = arith.constant 0 : i32
    %c0_i32_1 = arith.constant 0 : i32
    return %c0_i32, %c0_i32_0 : i32, i32
  }
  func.func @transform_5(%arg0: i32) -> (i32, i32) {
    %c0_i32 = arith.constant 0 : i32
    %c0_i32_0 = arith.constant 0 : i32
    %c0_i32_1 = arith.constant 0 : i32
    return %c0_i32, %c0_i32_0 : i32, i32
  }
  func.func @transform_6(%arg0: i32) -> (i32, i32) {
    %c0_i32 = arith.constant 0 : i32
    %c0_i32_0 = arith.constant 0 : i32
    %c0_i32_1 = arith.constant 0 : i32
    return %c0_i32, %c0_i32_0 : i32, i32
  }
  func.func @transform_7(%arg0: i32) -> (i32, i32) {
    %c0_i32 = arith.constant 0 : i32
    %c0_i32_0 = arith.constant 0 : i32
    return %arg0, %c0_i32 : i32, i32
  }
}

</mosaic_0001>

<bundles_post_ra>
// kernel: tpu_custom_call.1
= control target key start
LH: loop header
LB: loop body
LE: loop exit
PB: predicated region body
PF: predicated region fallthrough
CT: control target
= control target key end

     0   :  { %12 = vsyncpa [#allocation3], 0  ;;  %s2084_s0 = inlined_call_operand.hbm [shape: f32[8,128], index: 0, kind: input, shape index: {}]   ;;  %s2085_s1 = inlined_call_operand.hbm [shape: f32[128,128], index: 1, kind: input, shape index: {}]   ;;  %s2086_s2 = inlined_call_operand.vmem [shape: f32[1,128], index: 2, kind: input, shape index: {}]   ;;  %s2087_s3 = inlined_call_operand.hbm [shape: f32[128,128], index: 3, kind: input, shape index: {}]   ;;  %s2088_s4 = inlined_call_operand.vmem [shape: f32[1,128], index: 4, kind: input, shape index: {}]   ;;  %s2089_s5 = inlined_call_operand.hbm [shape: f32[128,128], index: 5, kind: input, shape index: {}]   ;;  %s2090_s6 = inlined_call_operand.vmem [shape: f32[1,128], index: 6, kind: input, shape index: {}]   ;;  %s2091_s7 = inlined_call_operand.hbm [shape: f32[8,128], index: 7, kind: output, shape index: {}]  }
   0x1   :  { %13 = vsyncpa [#allocation6], 0 }
   0x2   :  { %14 = vsyncpa [#allocation9], 0  ;;  %s31_s26 = sshll.u32 %s2085_s1, 4  ;;  %s32_s26 = int_to_ptr.hbm [resolvable:$true] %s31_s26 }
   0x3   :  { %15 = vsyncpa [#allocation4], 0  ;;  %s1332_s27 = smov [#allocation5]   ;;  %s21_s8 = sshll.u32 %s2084_s0, 4  ;;  %s22_s8 = int_to_ptr.hbm [resolvable:$true] %s21_s8 }
   0x4   :  { %s33_s28 = sshll.u32 %s1332_s27, 4  ;;  %s1333_s9 = smov 128   ;;  %s34_s28 = int_to_ptr.vmem [resolvable:$true] %s33_s28 }
   0x5   :  { %s1334_s10 = smov 8   ;;  %s1335_s11 = smov [#allocation2]  }
   0x6   :  { %39 = dma.hbm_to_vmem [thread:$0]  %s32_s26, 2048, %s34_s28, [#allocation6], %s1333_s9, %s1333_s9, %s1334_s10  }
   0x7   :  { %s23_s12 = sshll.u32 %s1335_s11, 4  ;;  %s46_s15 = sshll.u32 %s2087_s3, 4  ;;  %s24_s12 = int_to_ptr.vmem [resolvable:$true] %s23_s12  ;;  %s47_s15 = int_to_ptr.hbm [resolvable:$true] %s46_s15 }
   0x8   :  { %26 = dma.hbm_to_vmem [thread:$0]  %s22_s8, 128, %s24_s12, [#allocation3]  }
   0x9   :  { %s61_s17 = sshll.u32 %s2089_s5, 4  ;;  %s1336_s18 = smov [#allocation7]   ;;  %s62_s17 = int_to_ptr.hbm [resolvable:$true] %s61_s17 }
   0xa   :  { %s48_s19 = sshll.u32 %s1336_s18, 4  ;;  %s1337_s0 = smov [#allocation8]   ;;  %s49_s19 = int_to_ptr.vmem [resolvable:$true] %s48_s19 }
   0xb   :  { %54 = dma.hbm_to_vmem [thread:$0]  %s47_s15, 2048, %s49_s19, [#allocation6], %s1333_s9, %s1333_s9, %s1334_s10  }
   0xc   :  { %s63_s20 = sshll.u32 %s1337_s0, 4  ;;  %s64_s20 = int_to_ptr.vmem [resolvable:$true] %s63_s20 }
   0xd   :  { %69 = dma.hbm_to_vmem [thread:$0]  %s62_s17, 2048, %s64_s20, [#allocation9], %s1333_s9, %s1333_s9, %s1334_s10  }
   0xe   :  { %1324 = dma.done.wait [#allocation3], 128  }
   0xf   :  { %1325 = vsyncadd [#allocation3], 4294967168 }
  0x10   :  { %1326 = dma.done.wait [#allocation6], 4096  }
  0x11   :  { %1327 = vsyncadd [#allocation6], 4294963200 }
  0x12   :  { %1328 = dma.done.wait [#allocation9], 2048  }
  0x13   :  { %1329 = vsyncadd [#allocation9], 4294965248  ;;  %v104_v0 = vld [vmem:[#allocation5 + $0x78] sm:$0xff]  ;;  %v103_v1 = vld [vmem:[#allocation5 + $0x70] sm:$0xff]  ;;  %s1338_s23 = smov [#allocation10]   ;;  %s1182_s27 = sshll.u32 %s2091_s7, 4  ;;  %s1183_s27 = int_to_ptr.hbm [resolvable:$true] %s1182_s27 }
  0x14   :  { %v102_v2 = vld [vmem:[#allocation5 + $0x68] sm:$0xff]  ;;  %v1391_v3 = vand.u32 4294901760, %v104_v0  ;;  %v1393_v4 = vand.u32 4294901760, %v103_v1  ;;  %v101_v6 = vld [vmem:[#allocation5 + $0x60] sm:$0xff]  ;;  %v100_v7 = vld [vmem:[#allocation5 + $0x58] sm:$0xff]  ;;  %s1180_s24 = sshll.u32 %s1338_s23, 4  ;;  %s1181_s24 = int_to_ptr.vmem [resolvable:$true] %s1180_s24 }
  0x15   :  { %v1395_v5 = vand.u32 4294901760, %v102_v2  ;;  %v99_v8 = vld [vmem:[#allocation5 + $0x50] sm:$0xff]  ;;  %v1397_v9 = vand.u32 4294901760, %v101_v6  ;;  %v1399_v10 = vand.u32 4294901760, %v100_v7  ;;  %v98_v12 = vld [vmem:[#allocation5 + $0x48] sm:$0xff]  ;;  %v97_v13 = vld [vmem:[#allocation5 + $0x40] sm:$0xff] }
  0x16   :  { %v1401_v11 = vand.u32 4294901760, %v99_v8  ;;  %110 = vmatpush.msra.mxu0 %v1391_v3  ;;  %v1405_v14 = vsub.f32 %v104_v0, %v1391_v3  ;;  %v1408_v15 = vsub.f32 %v103_v1, %v1393_v4  ;;  %v1413_v17 = vand.u32 4294901760, %v98_v12  ;;  %306 = vmatpush.msra.mxu3 %v1391_v3  ;;  %v96_v21 = vld [vmem:[#allocation5 + $0x38] sm:$0xff]  ;;  %v95_v34 = vld [vmem:[#allocation5 + $0x30] sm:$0xff]  ;;  %v94_v35 = vld [vmem:[#allocation5 + $0x28] sm:$0xff] }
  0x17   :  { %v1411_v16 = vsub.f32 %v102_v2, %v1395_v5  ;;  %v1417_v18 = vsub.f32 %v101_v6, %v1397_v9  ;;  %v1420_v19 = vsub.f32 %v100_v7, %v1399_v10  ;;  %v1422_v20 = vand.u32 4294901760, %v97_v13  ;;  %v93_v42 = vld [vmem:[#allocation5 + $0x20] sm:$0xff]  ;;  %v92_v47 = vld [vmem:[#allocation5 + $0x18] sm:$0xff]  ;;  %v91_v53 = vld [vmem:[#allocation5 + $0x10] sm:$0xff] }
  0x18   :  { %112 = vmatpush.msra.mxu0 %v1393_v4  ;;  %v152_v22 = vand.u32 4294901760, %v1405_v14  ;;  %v158_v23 = vand.u32 4294901760, %v1408_v15  ;;  %v1429_v25 = vsub.f32 %v99_v8, %v1401_v11  ;;  %253 = vmatpush.msra.mxu2 %v1405_v14  ;;  %v1435_v28 = vsub.f32 %v98_v12, %v1413_v17  ;;  %v90_v61 = vld [vmem:[#allocation5 + $0x8] sm:$0xff]  ;;  %v89_v2 = vld [vmem:[#allocation5] sm:$0xff] }
  0x19   :  { %v164_v24 = vand.u32 4294901760, %v1411_v16  ;;  %v170_v26 = vand.u32 4294901760, %v1417_v18  ;;  %v176_v27 = vand.u32 4294901760, %v1420_v19  ;;  %308 = vmatpush.msra.mxu3 %v1393_v4  ;;  %v1448_v32 = vand.u32 4294901760, %v96_v21 }
  0x1a   :  { %v153_v29 = vsub.f32 %v1405_v14, %v152_v22  ;;  %114 = vmatpush.msra.mxu0 %v1395_v5  ;;  %v159_v30 = vsub.f32 %v1408_v15, %v158_v23  ;;  %256 = vmatpush.msra.mxu2 %v1408_v15  ;;  %v1452_v33 = vsub.f32 %v97_v13, %v1422_v20  ;;  %v182_v39 = vand.u32 4294901760, %v1429_v25  ;;  %v466_v14 = vld [vmem:[#allocation7 + $0x78] sm:$0xff] }
  0x1b   :  { %v165_v31 = vsub.f32 %v1411_v16, %v164_v24  ;;  %310 = vmatpush.msra.mxu3 %v1395_v5  ;;  %v171_v38 = vsub.f32 %v1417_v18, %v170_v26  ;;  %v177_v40 = vsub.f32 %v1420_v19, %v176_v27  ;;  %v188_v41 = vand.u32 4294901760, %v1435_v28 }
  0x1c   :  { %v154_v36 = vand.u32 4294901760, %v153_v29  ;;  %v160_v37 = vand.u32 4294901760, %v159_v30  ;;  %116 = vmatpush.msra.mxu0 %v1397_v9  ;;  %259 = vmatpush.msra.mxu2 %v1411_v16  ;;  %v1467_v44 = vand.u32 4294901760, %v95_v34  ;;  %v1470_v45 = vsub.f32 %v96_v21, %v1448_v32  ;;  %v88_v29 = vld [vmem:[#allocation2] sm:$0xff] }
  0x1d   :  { %312 = vmatpush.msra.mxu3 %v1397_v9  ;;  %v166_v43 = vand.u32 4294901760, %v165_v31  ;;  %v1472_v46 = vand.u32 4294901760, %v94_v35  ;;  %v194_v48 = vand.u32 4294901760, %v1452_v33  ;;  %v172_v49 = vand.u32 4294901760, %v171_v38 }
  0x1e   :  { %155 = vmatpush.msra.mxu1 %v154_v36  ;;  %118 = vmatpush.msra.mxu0 %v1399_v10  ;;  %v183_v50 = vsub.f32 %v1429_v25, %v182_v39  ;;  %v1482_v51 = vsub.f32 %v95_v34, %v1467_v44  ;;  %v1484_v52 = vand.u32 4294901760, %v93_v42  ;;  %v1486_v54 = vand.u32 4294901760, %v92_v47 }
  0x1f   :  { %262 = vmatpush.msra.mxu2 %v1417_v18  ;;  %314 = vmatpush.msra.mxu3 %v1399_v10  ;;  %v178_v55 = vand.u32 4294901760, %v177_v40  ;;  %v189_v56 = vsub.f32 %v1435_v28, %v188_v41  ;;  %v200_v57 = vand.u32 4294901760, %v1470_v45  ;;  %v1496_v58 = vsub.f32 %v94_v35, %v1472_v46 }
  0x20   :  { %161 = vmatpush.msra.mxu1 %v160_v37  ;;  %120 = vmatpush.msra.mxu0 %v1401_v11  ;;  %v195_v59 = vsub.f32 %v1452_v33, %v194_v48  ;;  %v1501_v60 = vand.u32 4294901760, %v91_v53  ;;  %v184_v62 = vand.u32 4294901760, %v183_v50  ;;  %v206_v63 = vand.u32 4294901760, %v1482_v51 }
  0x21   :  { %265 = vmatpush.msra.mxu2 %v1420_v19  ;;  %316 = vmatpush.msra.mxu3 %v1401_v11  ;;  %v1508_v0 = vsub.f32 %v93_v42, %v1484_v52  ;;  %v1511_v1 = vsub.f32 %v92_v47, %v1486_v54  ;;  %v190_v6 = vand.u32 4294901760, %v189_v56  ;;  %v201_v7 = vsub.f32 %v1470_v45, %v200_v57  ;;  %v459_v19 = vld [vmem:[#allocation7 + $0x40] sm:$0xff] }
  0x22   :  { %167 = vmatpush.msra.mxu1 %v166_v43  ;;  %122 = vmatpush.msra.mxu0 %v1413_v17  ;;  %v212_v8 = vand.u32 4294901760, %v1496_v58  ;;  %v1520_v12 = vand.u32 4294901760, %v90_v61  ;;  %v196_v13 = vand.u32 4294901760, %v195_v59  ;;  %v1523_v21 = vsub.f32 %v91_v53, %v1501_v60 }
  0x23   :  { %268 = vmatpush.msra.mxu2 %v1429_v25  ;;  %318 = vmatpush.msra.mxu3 %v1413_v17  ;;  %v207_v30 = vsub.f32 %v1482_v51, %v206_v63  ;;  %v218_v31 = vand.u32 4294901760, %v1508_v0  ;;  %v1532_v34 = vand.u32 4294901760, %v89_v2  ;;  %v1534_v35 = vand.u32 4294901760, %v88_v29 }
  0x24   :  { %173 = vmatpush.msra.mxu1 %v172_v49  ;;  %124 = vmatpush.msra.mxu0 %v1422_v20  ;;  %v224_v36 = vand.u32 4294901760, %v1511_v1  ;;  %v202_v37 = vand.u32 4294901760, %v201_v7  ;;  %v213_v38 = vsub.f32 %v1496_v58, %v212_v8  ;;  %v1544_v40 = vsub.f32 %v90_v61, %v1520_v12 }
  0x25   :  { %271 = vmatpush.msra.mxu2 %v1435_v28  ;;  %320 = vmatpush.msra.mxu3 %v1422_v20  ;;  %v142_v42 = vsub.f32 %v88_v29, %v1534_v35  ;;  %v208_v43 = vand.u32 4294901760, %v207_v30  ;;  %v219_v47 = vsub.f32 %v1508_v0, %v218_v31  ;;  %v230_v49 = vand.u32 4294901760, %v1523_v21 }
  0x26   :  { %179 = vmatpush.msra.mxu1 %v178_v55  ;;  %126 = vmatpush.msra.mxu0 %v1448_v32  ;;  %v1555_v50 = vsub.f32 %v89_v2, %v1532_v34  ;;  %v214_v53 = vand.u32 4294901760, %v213_v38  ;;  %v225_v55 = vsub.f32 %v1511_v1, %v224_v36  ;;  %v236_v56 = vand.u32 4294901760, %v1544_v40 }
  0x27   :  { %274 = vmatpush.msra.mxu2 %v1452_v33  ;;  %322 = vmatpush.msra.mxu3 %v1448_v32  ;;  %v143_v59 = vand.u32 4294901760, %v142_v42  ;;  %v220_v61 = vand.u32 4294901760, %v219_v47  ;;  %v464_v47 = vld [vmem:[#allocation7 + $0x68] sm:$0xff]  ;;  %v1597_v15 = vand.u32 4294901760, %v466_v14  ;;  %v458_v33 = vld [vmem:[#allocation7 + $0x38] sm:$0xff] }
  0x28   :  { %185 = vmatpush.msra.mxu1 %v184_v62  ;;  %128 = vmatpush.msra.mxu0 %v1467_v44  ;;  %v231_v62 = vsub.f32 %v1523_v21, %v230_v49  ;;  %v242_v2 = vand.u32 4294901760, %v1555_v50  ;;  %v237_v7 = vsub.f32 %v1544_v40, %v236_v56  ;;  %v1601_v16 = vand.u32 4294901760, %v464_v47 }
  0x29   :  { %277 = vmatpush.msra.mxu2 %v1470_v45  ;;  %324 = vmatpush.msra.mxu3 %v1467_v44  ;;  %v1676_v45 = vand.u32 4294901760, %v458_v33 }
  0x2a   :  { %191 = vmatpush.msra.mxu1 %v190_v6  ;;  %130 = vmatpush.msra.mxu0 %v1472_v46  ;;  %v226_v6 = vand.u32 4294901760, %v225_v55  ;;  %v232_v29 = vand.u32 4294901760, %v231_v62  ;;  %v243_v30 = vsub.f32 %v1555_v50, %v242_v2 }
  0x2b   :  { %280 = vmatpush.msra.mxu2 %v1482_v51  ;;  %326 = vmatpush.msra.mxu3 %v1472_v46  ;;  %v1691_v51 = vsub.f32 %v458_v33, %v1676_v45 }
  0x2c   :  { %197 = vmatpush.msra.mxu1 %v196_v13  ;;  %132 = vmatpush.msra.mxu0 %v1484_v52  ;;  %v144_v13 = vsub.f32 %v142_v42, %v143_v59 }
  0x2d   :  { %283 = vmatpush.msra.mxu2 %v1496_v58  ;;  %328 = vmatpush.msra.mxu3 %v1484_v52 }
  0x2e   :  { %203 = vmatpush.msra.mxu1 %v202_v37  ;;  %134 = vmatpush.msra.mxu0 %v1486_v54  ;;  %v238_v37 = vand.u32 4294901760, %v237_v7  ;;  %v145_v38 = vand.u32 4294901760, %v144_v13  ;;  %v1637_v13 = vand.u32 4294901760, %v459_v19 }
  0x2f   :  { %286 = vmatpush.msra.mxu2 %v1508_v0  ;;  %330 = vmatpush.msra.mxu3 %v1486_v54  ;;  %v452_v0 = vld [vmem:[#allocation7 + $0x8] sm:$0xff] }
  0x30   :  { %209 = vmatpush.msra.mxu1 %v208_v43  ;;  %136 = vmatpush.msra.mxu0 %v1501_v60  ;;  %v244_v43 = vand.u32 4294901760, %v243_v30 }
  0x31   :  { %289 = vmatpush.msra.mxu2 %v1511_v1  ;;  %332 = vmatpush.msra.mxu3 %v1501_v60  ;;  %v451_v1 = vld [vmem:[#allocation7] sm:$0xff] }
  0x32   :  { %215 = vmatpush.msra.mxu1 %v214_v53  ;;  %138 = vmatpush.msra.mxu0 %v1520_v12  ;;  %v461_v53 = vld [vmem:[#allocation7 + $0x50] sm:$0xff] }
  0x33   :  { %292 = vmatpush.msra.mxu2 %v1523_v21  ;;  %334 = vmatpush.msra.mxu3 %v1520_v12  ;;  %v1608_v55 = vand.u32 4294901760, %v461_v53 }
  0x34   :  { %221 = vmatpush.msra.mxu1 %v220_v61  ;;  %140 = vmatpush.msra.mxu0 %v1532_v34  ;;  %v1620_v61 = vsub.f32 %v464_v47, %v1601_v16 }
  0x35   :  { %295 = vmatpush.msra.mxu2 %v1544_v40  ;;  %336 = vmatpush.msra.mxu3 %v1532_v34  ;;  %v1642_v30 = vsub.f32 %v461_v53, %v1608_v55 }
  0x36   :  { %347 = vmatpush.msrb.mxu0 %v152_v22  ;;  %227 = vmatpush.msra.mxu1 %v226_v6  ;;  %v465_v22 = vld [vmem:[#allocation7 + $0x70] sm:$0xff]  ;;  %v526_v7 = vand.u32 4294901760, %v1620_v61 }
  0x37   :  { %298 = vmatpush.msra.mxu2 %v1555_v50  ;;  %340 = vmatmul.f32.vlgmr.msra.gmra.mxu3 %v143_v59 }
  0x38   :  { %351 = vmatpush.msrb.mxu0 %v158_v23  ;;  %233 = vmatpush.msra.mxu1 %v232_v29  ;;  %v1599_v23 = vand.u32 4294901760, %v465_v22 }
  0x39   :  { %301 = vmatmul.f32.vlgmr.msra.gmra.mxu2 %v142_v42  ;;  %146 = vmatmul.f32.vlgmr.msra.gmra.mxu0 %v145_v38  ;;  %v462_v42 = vld [vmem:[#allocation7 + $0x58] sm:$0xff] }
  0x3a   :  { %355 = vmatpush.msrb.mxu0 %v164_v24  ;;  %239 = vmatpush.msra.mxu1 %v238_v37  ;;  %v463_v24 = vld [vmem:[#allocation7 + $0x60] sm:$0xff]  ;;  %v1617_v59 = vsub.f32 %v465_v22, %v1599_v23  ;;  %v527_v37 = vsub.f32 %v1620_v61, %v526_v7 }
  0x3b   :  { %v1604_v18 = vand.u32 4294901760, %v463_v24  ;;  %472 = vmatpush.msrb.mxu2 %v1597_v15 }
  0x3c   :  { %359 = vmatpush.msrb.mxu0 %v170_v26  ;;  %245 = vmatpush.msra.mxu1 %v244_v43  ;;  %v1606_v26 = vand.u32 4294901760, %v462_v42  ;;  %v1665_v43 = vsub.f32 %v459_v19, %v1637_v13  ;;  %v528_v53 = vand.u32 4294901760, %v527_v37 }
  0x3d   :  { %247 = vmatmul.f32.vlgmr.msra.gmra.mxu1 %v1534_v35  ;;  %v1625_v6 = vsub.f32 %v463_v24, %v1604_v18  ;;  %474 = vmatpush.msrb.mxu2 %v1599_v23  ;;  %v544_v24 = vand.u32 4294901760, %v1642_v30 }
  0x3e   :  { %414 = vmatpush.msrb.mxu1 %v1391_v3  ;;  %363 = vmatpush.msrb.mxu0 %v176_v27  ;;  %v460_v3 = vld [vmem:[#allocation7 + $0x48] sm:$0xff]  ;;  %v1614_v27 = vsub.f32 %v466_v14, %v1597_v15 }
  0x3f   :  { %v1622_v62 = vand.u32 4294901760, %v460_v3  ;;  %v532_v29 = vand.u32 4294901760, %v1625_v6  ;;  %476 = vmatpush.msrb.mxu2 %v1601_v16  ;;  %v456_v14 = vld [vmem:[#allocation7 + $0x28] sm:$0xff] }
  0x40   :  { %416 = vmatpush.msrb.mxu1 %v1393_v4  ;;  %367 = vmatpush.msrb.mxu0 %v182_v39  ;;  %v1629_v4 = vsub.f32 %v462_v42, %v1606_v26  ;;  %v514_v25 = vand.u32 4294901760, %v1614_v27  ;;  %v520_v39 = vand.u32 4294901760, %v1617_v59  ;;  %v455_v42 = vld [vmem:[#allocation7 + $0x20] sm:$0xff]  ;;  %v1684_v19 = vand.u32 4294901760, %v456_v14 }
  0x41   :  { %v533_v47 = vsub.f32 %v1625_v6, %v532_v29  ;;  %478 = vmatpush.msrb.mxu2 %v1604_v18 }
  0x42   :  { %418 = vmatpush.msrb.mxu1 %v1395_v5  ;;  %371 = vmatpush.msrb.mxu0 %v188_v41  ;;  %v515_v5 = vsub.f32 %v1614_v27, %v514_v25  ;;  %v521_v28 = vsub.f32 %v1617_v59, %v520_v39  ;;  %v1654_v41 = vsub.f32 %v460_v3, %v1622_v62 }
  0x43   :  { %480 = vmatpush.msrb.mxu2 %v1606_v26 }
  0x44   :  { %420 = vmatpush.msrb.mxu1 %v1397_v9  ;;  %375 = vmatpush.msrb.mxu0 %v194_v48  ;;  %v538_v9 = vand.u32 4294901760, %v1629_v4  ;;  %v457_v48 = vld [vmem:[#allocation7 + $0x30] sm:$0xff]  ;;  %v516_v38 = vand.u32 4294901760, %v515_v5  ;;  %v522_v22 = vand.u32 4294901760, %v521_v28  ;;  %v534_v5 = vand.u32 4294901760, %v533_v47 }
  0x45   :  { %v545_v28 = vsub.f32 %v1642_v30, %v544_v24  ;;  %482 = vmatpush.msrb.mxu2 %v1608_v55 }
  0x46   :  { %422 = vmatpush.msrb.mxu1 %v1399_v10  ;;  %379 = vmatpush.msrb.mxu0 %v200_v57  ;;  %v550_v10 = vand.u32 4294901760, %v1654_v41  ;;  %v1678_v57 = vand.u32 4294901760, %v457_v48  ;;  %v539_v3 = vsub.f32 %v1629_v4, %v538_v9 }
  0x47   :  { %517 = vmatpush.msrb.mxu3 %v516_v38  ;;  %v562_v38 = vand.u32 4294901760, %v1691_v51  ;;  %484 = vmatpush.msrb.mxu2 %v1622_v62 }
  0x48   :  { %424 = vmatpush.msrb.mxu1 %v1401_v11  ;;  %383 = vmatpush.msrb.mxu0 %v206_v63  ;;  %v556_v11 = vand.u32 4294901760, %v1665_v43  ;;  %v454_v63 = vld [vmem:[#allocation7 + $0x18] sm:$0xff]  ;;  %v1698_v37 = vsub.f32 %v457_v48, %v1678_v57  ;;  %v551_v58 = vsub.f32 %v1654_v41, %v550_v10  ;;  %v540_v33 = vand.u32 4294901760, %v539_v3 }
  0x49   :  { %523 = vmatpush.msrb.mxu3 %v522_v22  ;;  %v1711_v48 = vsub.f32 %v456_v14, %v1684_v19  ;;  %v1713_v22 = vand.u32 4294901760, %v454_v63  ;;  %486 = vmatpush.msrb.mxu2 %v1637_v13 }
  0x4a   :  { %426 = vmatpush.msrb.mxu1 %v1413_v17  ;;  %387 = vmatpush.msrb.mxu0 %v212_v8  ;;  %v1700_v17 = vand.u32 4294901760, %v455_v42  ;;  %v453_v8 = vld [vmem:[#allocation7 + $0x10] sm:$0xff]  ;;  %v568_v47 = vand.u32 4294901760, %v1698_v37 }
  0x4b   :  { %529 = vmatpush.msrb.mxu3 %v528_v53  ;;  %v1726_v53 = vand.u32 4294901760, %v453_v8  ;;  %v574_v3 = vand.u32 4294901760, %v1711_v48  ;;  %488 = vmatpush.msrb.mxu2 %v1676_v45 }
  0x4c   :  { %428 = vmatpush.msrb.mxu1 %v1422_v20  ;;  %391 = vmatpush.msrb.mxu0 %v218_v31  ;;  %v557_v20 = vsub.f32 %v1665_v43, %v556_v11  ;;  %v546_v31 = vand.u32 4294901760, %v545_v28  ;;  %v1724_v14 = vsub.f32 %v455_v42, %v1700_v17  ;;  %v1737_v42 = vsub.f32 %v454_v63, %v1713_v22 }
  0x4d   :  { %535 = vmatpush.msrb.mxu3 %v534_v5  ;;  %v1739_v5 = vand.u32 4294901760, %v452_v0  ;;  %v569_v21 = vsub.f32 %v1698_v37, %v568_v47  ;;  %490 = vmatpush.msrb.mxu2 %v1678_v57  ;;  %v1750_v63 = vsub.f32 %v453_v8, %v1726_v53  ;;  %v1752_v28 = vand.u32 4294901760, %v451_v1 }
  0x4e   :  { %430 = vmatpush.msrb.mxu1 %v1448_v32  ;;  %395 = vmatpush.msrb.mxu0 %v224_v36  ;;  %v552_v32 = vand.u32 4294901760, %v551_v58  ;;  %v563_v36 = vsub.f32 %v1691_v51, %v562_v38  ;;  %v575_v40 = vsub.f32 %v1711_v48, %v574_v3 }
  0x4f   :  { %541 = vmatpush.msrb.mxu3 %v540_v33  ;;  %v1763_v58 = vsub.f32 %v452_v0, %v1739_v5  ;;  %492 = vmatpush.msrb.mxu2 %v1684_v19  ;;  %v1773_v8 = vsub.f32 %v451_v1, %v1752_v28 }
  0x50   :  { %432 = vmatpush.msrb.mxu1 %v1467_v44  ;;  %399 = vmatpush.msrb.mxu0 %v230_v49  ;;  %v558_v44 = vand.u32 4294901760, %v557_v20  ;;  %v580_v49 = vand.u32 4294901760, %v1724_v14 }
  0x51   :  { %547 = vmatpush.msrb.mxu3 %v546_v31  ;;  %v598_v20 = vand.u32 4294901760, %v1763_v58  ;;  %494 = vmatpush.msrb.mxu2 %v1700_v17  ;;  %v604_v31 = vand.u32 4294901760, %v1773_v8 }
  0x52   :  { %434 = vmatpush.msrb.mxu1 %v1472_v46  ;;  %403 = vmatpush.msrb.mxu0 %v236_v56  ;;  %v564_v46 = vand.u32 4294901760, %v563_v36  ;;  %v586_v56 = vand.u32 4294901760, %v1737_v42  ;;  %v581_v50 = vsub.f32 %v1724_v14, %v580_v49 }
  0x53   :  { %553 = vmatpush.msrb.mxu3 %v552_v32  ;;  %496 = vmatpush.msrb.mxu2 %v1713_v22  ;;  %v599_v32 = vsub.f32 %v1763_v58, %v598_v20 }
  0x54   :  { %436 = vmatpush.msrb.mxu1 %v1484_v52  ;;  %407 = vmatpush.msrb.mxu0 %v242_v2  ;;  %v570_v52 = vand.u32 4294901760, %v569_v21  ;;  %v592_v2 = vand.u32 4294901760, %v1750_v63  ;;  %v587_v33 = vsub.f32 %v1737_v42, %v586_v56  ;;  %v582_v0 = vand.u32 4294901760, %v581_v50 }
  0x55   :  { %409 = vmatmul.f32.vlgmr.msrb.gmra.mxu0 %v1534_v35  ;;  %559 = vmatpush.msrb.mxu3 %v558_v44 }
  0x56   :  { %438 = vmatpush.msrb.mxu1 %v1486_v54  ;;  %615 = vmatpush.msra.mxu0 %v1614_v27  ;;  %v576_v54 = vand.u32 4294901760, %v575_v40  ;;  %v819_v40 = vld [vmem:[#allocation8 + $0x30] sm:$0xff] }
  0x57   :  { %565 = vmatpush.msrb.mxu3 %v564_v46  ;;  %498 = vmatpush.msrb.mxu2 %v1726_v53  ;;  %v820_v46 = vld [vmem:[#allocation8 + $0x38] sm:$0xff] }
  0x58   :  { %440 = vmatpush.msrb.mxu1 %v1501_v60  ;;  %618 = vmatpush.msra.mxu0 %v1617_v59  ;;  %v593_v60 = vsub.f32 %v1750_v63, %v592_v2 }
  0x59   :  { %571 = vmatpush.msrb.mxu3 %v570_v52  ;;  %500 = vmatpush.msrb.mxu2 %v1739_v5 }
  0x5a   :  { %442 = vmatpush.msrb.mxu1 %v1520_v12  ;;  %621 = vmatpush.msra.mxu0 %v1620_v61  ;;  %v588_v12 = vand.u32 4294901760, %v587_v33  ;;  %v594_v1 = vand.u32 4294901760, %v593_v60  ;;  %v828_v61 = vld [vmem:[#allocation8 + $0x78] sm:$0xff]  ;;  %v817_v33 = vld [vmem:[#allocation8 + $0x20] sm:$0xff]  ;;  %v1947_v60 = vand.u32 4294901760, %v820_v46 }
  0x5b   :  { %577 = vmatpush.msrb.mxu3 %v576_v54  ;;  %502 = vmatpush.msrb.mxu2 %v1752_v28 }
  0x5c   :  { %444 = vmatpush.msrb.mxu1 %v1532_v34  ;;  %624 = vmatpush.msra.mxu0 %v1625_v6  ;;  %v605_v34 = vsub.f32 %v1773_v8, %v604_v31  ;;  %v826_v6 = vld [vmem:[#allocation8 + $0x68] sm:$0xff] }
  0x5d   :  { %446 = vmatmul.f32.vlgmr.msrb.gmra.mxu1 %v1534_v35  ;;  %583 = vmatpush.msrb.mxu3 %v582_v0  ;;  %v600_v35 = vand.u32 4294901760, %v599_v32 }
  0x5e   :  { %668 = vmatpush.msra.mxu1 %v1597_v15  ;;  %627 = vmatpush.msra.mxu0 %v1629_v4  ;;  %v606_v36 = vand.u32 4294901760, %v605_v34  ;;  %v1880_v4 = vand.u32 4294901760, %v828_v61 }
  0x5f   :  { %589 = vmatpush.msrb.mxu3 %v588_v12  ;;  %709 = vmatpush.msra.mxu2 %v514_v25 }
  0x60   :  { %670 = vmatpush.msra.mxu1 %v1599_v23  ;;  %630 = vmatpush.msra.mxu0 %v1642_v30 }
  0x61   :  { %595 = vmatpush.msrb.mxu3 %v594_v1  ;;  %713 = vmatpush.msra.mxu2 %v520_v39  ;;  %v1884_v39 = vand.u32 4294901760, %v826_v6 }
  0x62   :  { %672 = vmatpush.msra.mxu1 %v1601_v16  ;;  %633 = vmatpush.msra.mxu0 %v1654_v41 }
  0x63   :  { %601 = vmatpush.msrb.mxu3 %v600_v35  ;;  %717 = vmatpush.msra.mxu2 %v526_v7  ;;  %v825_v7 = vld [vmem:[#allocation8 + $0x60] sm:$0xff]  ;;  %v816_v35 = vld [vmem:[#allocation8 + $0x18] sm:$0xff] }
  0x64   :  { %674 = vmatpush.msra.mxu1 %v1604_v18  ;;  %636 = vmatpush.msra.mxu0 %v1665_v43  ;;  %v1886_v41 = vand.u32 4294901760, %v825_v7 }
  0x65   :  { %607 = vmatpush.msrb.mxu3 %v606_v36  ;;  %721 = vmatpush.msra.mxu2 %v532_v29  ;;  %v823_v29 = vld [vmem:[#allocation8 + $0x50] sm:$0xff] }
  0x66   :  { %676 = vmatpush.msra.mxu1 %v1606_v26  ;;  %639 = vmatpush.msra.mxu0 %v1691_v51  ;;  %v1890_v43 = vand.u32 4294901760, %v823_v29 }
  0x67   :  { %776 = vmatpush.msra.mxu3 %v1597_v15  ;;  %725 = vmatpush.msra.mxu2 %v538_v9  ;;  %v1201_v15 = vld [vmem:[%s2086_s2] ss:$0 sm:$0xff] }
  0x68   :  { %678 = vmatpush.msra.mxu1 %v1608_v55  ;;  %642 = vmatpush.msra.mxu0 %v1698_v37  ;;  %v1905_v37 = vsub.f32 %v825_v7, %v1886_v41 }
  0x69   :  { %778 = vmatpush.msra.mxu3 %v1599_v23  ;;  %729 = vmatpush.msra.mxu2 %v544_v24  ;;  %v822_v24 = vld [vmem:[#allocation8 + $0x48] sm:$0xff] }
  0x6a   :  { %680 = vmatpush.msra.mxu1 %v1622_v62  ;;  %645 = vmatpush.msra.mxu0 %v1711_v48  ;;  %v1902_v51 = vand.u32 4294901760, %v822_v24 }
  0x6b   :  { %780 = vmatpush.msra.mxu3 %v1601_v16  ;;  %733 = vmatpush.msra.mxu2 %v550_v10  ;;  %v821_v10 = vld [vmem:[#allocation8 + $0x40] sm:$0xff] }
  0x6c   :  { %682 = vmatpush.msra.mxu1 %v1637_v13  ;;  %648 = vmatpush.msra.mxu0 %v1724_v14  ;;  %v1913_v48 = vand.u32 4294901760, %v821_v10 }
  0x6d   :  { %782 = vmatpush.msra.mxu3 %v1604_v18  ;;  %737 = vmatpush.msra.mxu2 %v556_v11  ;;  %v1899_v11 = vsub.f32 %v826_v6, %v1884_v39 }
  0x6e   :  { %684 = vmatpush.msra.mxu1 %v1676_v45  ;;  %651 = vmatpush.msra.mxu0 %v1737_v42  ;;  %v1921_v42 = vsub.f32 %v822_v24, %v1902_v51 }
  0x6f   :  { %784 = vmatpush.msra.mxu3 %v1606_v26  ;;  %741 = vmatpush.msra.mxu2 %v562_v38  ;;  %v1911_v38 = vsub.f32 %v823_v29, %v1890_v43  ;;  %v888_v14 = vand.u32 4294901760, %v1899_v11 }
  0x70   :  { %686 = vmatpush.msra.mxu1 %v1678_v57  ;;  %654 = vmatpush.msra.mxu0 %v1750_v63  ;;  %v912_v54 = vand.u32 4294901760, %v1921_v42 }
  0x71   :  { %786 = vmatpush.msra.mxu3 %v1608_v55  ;;  %745 = vmatpush.msra.mxu2 %v568_v47  ;;  %v889_v21 = vsub.f32 %v1899_v11, %v888_v14  ;;  %v906_v63 = vand.u32 4294901760, %v1911_v38 }
  0x72   :  { %688 = vmatpush.msra.mxu1 %v1684_v19  ;;  %657 = vmatpush.msra.mxu0 %v1763_v58 }
  0x73   :  { %788 = vmatpush.msra.mxu3 %v1622_v62  ;;  %749 = vmatpush.msra.mxu2 %v574_v3  ;;  %v827_v62 = vld [vmem:[#allocation8 + $0x70] sm:$0xff]  ;;  %v894_v3 = vand.u32 4294901760, %v1905_v37  ;;  %v907_v32 = vsub.f32 %v1911_v38, %v906_v63 }
  0x74   :  { %690 = vmatpush.msra.mxu1 %v1700_v17  ;;  %660 = vmatpush.msra.mxu0 %v1773_v8  ;;  %v1882_v25 = vand.u32 4294901760, %v827_v62 }
  0x75   :  { %790 = vmatpush.msra.mxu3 %v1637_v13  ;;  %753 = vmatpush.msra.mxu2 %v580_v49  ;;  %v824_v13 = vld [vmem:[#allocation8 + $0x58] sm:$0xff]  ;;  %v895_v50 = vsub.f32 %v1905_v37, %v894_v3  ;;  %v908_v6 = vand.u32 4294901760, %v907_v32 }
  0x76   :  { %692 = vmatpush.msra.mxu1 %v1713_v22  ;;  %v1888_v9 = vand.u32 4294901760, %v824_v13  ;;  %834 = vmatpush.msrb.mxu0 %v1880_v4 }
  0x77   :  { %792 = vmatpush.msra.mxu3 %v1676_v45  ;;  %757 = vmatpush.msra.mxu2 %v586_v56  ;;  %v896_v36 = vand.u32 4294901760, %v895_v50 }
  0x78   :  { %694 = vmatpush.msra.mxu1 %v1726_v53  ;;  %836 = vmatpush.msrb.mxu0 %v1882_v25 }
  0x79   :  { %794 = vmatpush.msra.mxu3 %v1678_v57  ;;  %761 = vmatpush.msra.mxu2 %v592_v2  ;;  %v1893_v57 = vsub.f32 %v828_v61, %v1880_v4  ;;  %v818_v2 = vld [vmem:[#allocation8 + $0x28] sm:$0xff]  ;;  %v1974_v61 = vand.u32 4294901760, %v816_v35 }
  0x7a   :  { %696 = vmatpush.msra.mxu1 %v1739_v5  ;;  %838 = vmatpush.msrb.mxu0 %v1884_v39  ;;  %v1955_v34 = vand.u32 4294901760, %v818_v2 }
  0x7b   :  { %796 = vmatpush.msra.mxu3 %v1684_v19  ;;  %765 = vmatpush.msra.mxu2 %v598_v20  ;;  %v1896_v19 = vsub.f32 %v827_v62, %v1882_v25  ;;  %v890_v20 = vand.u32 4294901760, %v889_v21 }
  0x7c   :  { %698 = vmatpush.msra.mxu1 %v1752_v28  ;;  %840 = vmatpush.msrb.mxu0 %v1886_v41 }
  0x7d   :  { %798 = vmatpush.msra.mxu3 %v1700_v17  ;;  %769 = vmatpush.msra.mxu2 %v604_v31  ;;  %v1908_v17 = vsub.f32 %v824_v13, %v1888_v9  ;;  %v882_v47 = vand.u32 4294901760, %v1896_v19  ;;  %v1949_v31 = vand.u32 4294901760, %v819_v40 }
  0x7e   :  { %842 = vmatpush.msrb.mxu0 %v1888_v9 }
  0x7f   :  { %800 = vmatpush.msra.mxu3 %v1713_v22  ;;  %v876_v22 = vand.u32 4294901760, %v1893_v57  ;;  %v883_v44 = vsub.f32 %v1896_v19, %v882_v47  ;;  %v900_v49 = vand.u32 4294901760, %v1908_v17 }
  0x80   :  { %844 = vmatpush.msrb.mxu0 %v1890_v43 }
  0x81   :  { %802 = vmatpush.msra.mxu3 %v1726_v53  ;;  %v884_v52 = vand.u32 4294901760, %v883_v44  ;;  %v901_v0 = vsub.f32 %v1908_v17, %v900_v49 }
  0x82   :  { %846 = vmatpush.msrb.mxu0 %v1902_v51 }
  0x83   :  { %804 = vmatpush.msra.mxu3 %v1739_v5  ;;  %v877_v5 = vsub.f32 %v1893_v57, %v876_v22 }
  0x84   :  { %848 = vmatpush.msrb.mxu0 %v1913_v48 }
  0x85   :  { %806 = vmatpush.msra.mxu3 %v1752_v28  ;;  %v1936_v28 = vsub.f32 %v821_v10, %v1913_v48  ;;  %v878_v58 = vand.u32 4294901760, %v877_v5 }
  0x86   :  { %850 = vmatpush.msrb.mxu0 %v1947_v60 }
  0x87   :  { %879 = vmatpush.msrb.mxu1 %v878_v58  ;;  %v918_v1 = vand.u32 4294901760, %v1936_v28 }
  0x88   :  { %852 = vmatpush.msrb.mxu0 %v1949_v31 }
  0x89   :  { %885 = vmatpush.msrb.mxu1 %v884_v52  ;;  %v919_v7 = vsub.f32 %v1936_v28, %v918_v1 }
  0x8a   :  { %854 = vmatpush.msrb.mxu0 %v1955_v34 }
  0x8b   :  { %891 = vmatpush.msrb.mxu1 %v890_v20  ;;  %v920_v44 = vand.u32 4294901760, %v919_v7 }
  0x8d   :  { %897 = vmatpush.msrb.mxu1 %v896_v36 }
  0xb6   :  { %v147_v23 = vpop.f32.mrf.mxu0 }
  0xb7   :  { %v148_v16 = vadd.f32 %v1201_v15, %v147_v23  ;;  %v1958_v15 = vsub.f32 %v820_v46, %v1947_v60  ;;  %v1962_v23 = vsub.f32 %v819_v40, %v1949_v31 }
  0xb9   :  { %v930_v13 = vand.u32 4294901760, %v1962_v23 }
  0xba   :  { %v248_v18 = vpop.f32.mrf.mxu1  ;;  %v341_v59 = vpop.f32.mrf.mxu3 }
  0xbb   :  { %v249_v26 = vadd.f32 %v248_v18, %v148_v16  ;;  %v1964_v16 = vand.u32 4294901760, %v817_v33  ;;  %v931_v21 = vsub.f32 %v1962_v23, %v930_v13 }
  0xbc   :  { %v302_v55 = vpop.f32.mrf.mxu2 }
  0xbd   :  { %v303_v27 = vadd.f32 %v302_v55, %v249_v26  ;;  %v913_v26 = vsub.f32 %v1921_v42, %v912_v54  ;;  %v902_v55 = vand.u32 4294901760, %v901_v0  ;;  %v1982_v29 = vsub.f32 %v817_v33, %v1964_v16  ;;  %856 = vmatpush.msrb.mxu0 %v1964_v16 }
  0xbe   :  { %v932_v50 = vand.u32 4294901760, %v931_v21 }
  0xbf   :  { %v342_v30 = vadd.f32 %v341_v59, %v303_v27  ;;  %v924_v27 = vand.u32 4294901760, %v1958_v15  ;;  %v1972_v59 = vsub.f32 %v818_v2, %v1955_v34  ;;  %903 = vmatpush.msrb.mxu1 %v902_v55  ;;  %v914_v24 = vand.u32 4294901760, %v913_v26  ;;  %858 = vmatpush.msrb.mxu0 %v1974_v61  ;;  %v813_v26 = vld [vmem:[#allocation8] sm:$0xff] }
  0xc0   :  { %v942_v46 = vand.u32 4294901760, %v1982_v29 }
  0xc1   :  { %v925_v10 = vsub.f32 %v1958_v15, %v924_v27  ;;  %909 = vmatpush.msrb.mxu1 %v908_v6  ;;  %v863_v6 = vand.u32 4294901760, %v813_v26 }
  0xc2   :  { %v943_v2 = vsub.f32 %v1982_v29, %v942_v46 }
  0xc3   :  { %915 = vmatpush.msrb.mxu1 %v914_v24  ;;  %v965_v24 = vsub.f32 %v813_v26, %v863_v6 }
  0xc4   :  { %v944_v20 = vand.u32 4294901760, %v943_v2 }
  0xc5   :  { %921 = vmatpush.msrb.mxu1 %v920_v44  ;;  %v966_v44 = vand.u32 4294901760, %v965_v24 }
  0xd2   :  { %v410_v45 = vpop.f32.mrf.mxu0 }
  0xd3   :  { %v411_v53 = vadd.f32 %v410_v45, %v342_v30  ;;  %v936_v45 = vand.u32 4294901760, %v1972_v59 }
  0xd5   :  { %v937_v58 = vsub.f32 %v1972_v59, %v936_v45 }
  0xda   :  { %v447_v56 = vpop.f32.mrf.mxu1 }
  0xdb   :  { %v448_v8 = vadd.f32 %v447_v56, %v411_v53  ;;  %v1991_v53 = vsub.f32 %v816_v35, %v1974_v61  ;;  %v926_v56 = vand.u32 4294901760, %v925_v10  ;;  %v814_v35 = vld [vmem:[#allocation8 + $0x8] sm:$0xff] }
  0xdd   :  { %v450_v12 = vmax.f32 %v448_v8, 0.0  ;;  %v948_v52 = vand.u32 4294901760, %v1991_v53  ;;  %927 = vmatpush.msrb.mxu1 %v926_v56  ;;  %v938_v8 = vand.u32 4294901760, %v937_v58 }
  0xdf   :  { %v503_v18 = vand.u32 4294901760, %v450_v12  ;;  %v949_v33 = vsub.f32 %v1991_v53, %v948_v52  ;;  %933 = vmatpush.msrb.mxu1 %v932_v50 }
  0xe1   :  { %v504_v62 = vsub.f32 %v450_v12, %v503_v18  ;;  %609 = vmatmul.f32.vlgmr.msrb.gmra.mxu3 %v503_v18  ;;  %939 = vmatpush.msrb.mxu1 %v938_v8  ;;  %v950_v0 = vand.u32 4294901760, %v949_v33  ;;  %v815_v12 = vld [vmem:[#allocation8 + $0x10] sm:$0xff] }
  0xe2   :  { %1030 = vmatpush.msrb.mxu3 %v1880_v4  ;;  %v859_v32 = vand.u32 4294901760, %v815_v12 }
  0xe3   :  { %663 = vmatmul.f32.vlgmr.msra.gmra.mxu0 %v504_v62  ;;  %v505_v30 = vand.u32 4294901760, %v504_v62  ;;  %945 = vmatpush.msrb.mxu1 %v944_v20 }
  0xe4   :  { %1032 = vmatpush.msrb.mxu3 %v1882_v25  ;;  %v953_v36 = vsub.f32 %v815_v12, %v859_v32  ;;  %860 = vmatpush.msrb.mxu0 %v859_v32 }
  0xe5   :  { %702 = vmatmul.f32.vlgmr.msra.gmra.mxu1 %v505_v30  ;;  %v506_v5 = vsub.f32 %v504_v62, %v505_v30 }
  0xe6   :  { %1034 = vmatpush.msrb.mxu3 %v1884_v39  ;;  %951 = vmatpush.msrb.mxu1 %v950_v0  ;;  %v954_v55 = vand.u32 4294901760, %v953_v36 }
  0xe7   :  { %v507_v40 = vand.u32 4294901760, %v506_v5 }
  0xe8   :  { %1036 = vmatpush.msrb.mxu3 %v1886_v41  ;;  %v955_v7 = vsub.f32 %v953_v36, %v954_v55 }
  0xe9   :  { %508 = vmatmul.f32.vlgmr.msrb.gmra.mxu2 %v507_v40  ;;  %808 = vmatmul.f32.vlgmr.msra.gmra.mxu3 %v503_v18  ;;  %v967_v40 = vsub.f32 %v965_v24, %v966_v44 }
  0xea   :  { %977 = vmatpush.msrb.mxu2 %v1893_v57  ;;  %1038 = vmatpush.msrb.mxu3 %v1888_v9  ;;  %v956_v10 = vand.u32 4294901760, %v955_v7 }
  0xeb   :  { %v968_v56 = vand.u32 4294901760, %v967_v40 }
  0xec   :  { %980 = vmatpush.msrb.mxu2 %v1896_v19  ;;  %1040 = vmatpush.msrb.mxu3 %v1890_v43 }
  0xed   :  { %957 = vmatpush.msrb.mxu1 %v956_v10 }
  0xee   :  { %983 = vmatpush.msrb.mxu2 %v1899_v11  ;;  %1042 = vmatpush.msrb.mxu3 %v1902_v51 }
  0xf0   :  { %986 = vmatpush.msrb.mxu2 %v1905_v37  ;;  %1044 = vmatpush.msrb.mxu3 %v1913_v48 }
  0xf1   :  { %771 = vmatmul.f32.vlgmr.msra.gmra.mxu2 %v503_v18  ;;  %v861_v18 = vand.u32 4294901760, %v814_v35 }
  0xf2   :  { %989 = vmatpush.msrb.mxu2 %v1908_v17  ;;  %1046 = vmatpush.msrb.mxu3 %v1947_v60 }
  0xf3   :  { %v959_v62 = vsub.f32 %v814_v35, %v861_v18  ;;  %862 = vmatpush.msrb.mxu0 %v861_v18 }
  0xf4   :  { %992 = vmatpush.msrb.mxu2 %v1911_v38  ;;  %1048 = vmatpush.msrb.mxu3 %v1949_v31 }
  0xf5   :  { %v960_v30 = vand.u32 4294901760, %v959_v62  ;;  %864 = vmatpush.msrb.mxu0 %v863_v6 }
  0xf6   :  { %995 = vmatpush.msrb.mxu2 %v1921_v42  ;;  %1050 = vmatpush.msrb.mxu3 %v1955_v34 }
  0xf7   :  { %1071 = vmatpush.msra.mxu0 %v876_v22  ;;  %v961_v5 = vsub.f32 %v959_v62, %v960_v30 }
  0xf8   :  { %998 = vmatpush.msrb.mxu2 %v1936_v28  ;;  %1052 = vmatpush.msrb.mxu3 %v1964_v16 }
  0xf9   :  { %1075 = vmatpush.msra.mxu0 %v882_v47  ;;  %v962_v21 = vand.u32 4294901760, %v961_v5 }
  0xfa   :  { %1001 = vmatpush.msrb.mxu2 %v1958_v15  ;;  %1054 = vmatpush.msrb.mxu3 %v1974_v61 }
  0xfb   :  { %1079 = vmatpush.msra.mxu0 %v888_v14  ;;  %963 = vmatpush.msrb.mxu1 %v962_v21 }
  0xfc   :  { %1004 = vmatpush.msrb.mxu2 %v1962_v23  ;;  %1056 = vmatpush.msrb.mxu3 %v859_v32 }
  0xfd   :  { %1083 = vmatpush.msra.mxu0 %v894_v3  ;;  %969 = vmatpush.msrb.mxu1 %v968_v56 }
  0xfe   :  { %1007 = vmatpush.msrb.mxu2 %v1972_v59  ;;  %1058 = vmatpush.msrb.mxu3 %v861_v18 }
  0xff   :  { %1138 = vmatpush.msra.mxu1 %v1880_v4  ;;  %1087 = vmatpush.msra.mxu0 %v900_v49  ;;  %v1202_v4 = vld [vmem:[%s2088_s4] ss:$0 sm:$0xff] }
 0x100   :  { %1010 = vmatpush.msrb.mxu2 %v1982_v29  ;;  %1060 = vmatpush.msrb.mxu3 %v863_v6  ;;  %v1203_v49 = vld [vmem:[%s2090_s6] ss:$0 sm:$0xff] }
 0x101   :  { %1140 = vmatpush.msra.mxu1 %v1882_v25  ;;  %1091 = vmatpush.msra.mxu0 %v906_v63 }
 0x102   :  { %1013 = vmatpush.msrb.mxu2 %v1991_v53 }
 0x103   :  { %1142 = vmatpush.msra.mxu1 %v1884_v39  ;;  %1095 = vmatpush.msra.mxu0 %v912_v54 }
 0x104   :  { %1016 = vmatpush.msrb.mxu2 %v953_v36 }
 0x105   :  { %1144 = vmatpush.msra.mxu1 %v1886_v41  ;;  %1099 = vmatpush.msra.mxu0 %v918_v1 }
 0x106   :  { %1019 = vmatpush.msrb.mxu2 %v959_v62 }
 0x107   :  { %1146 = vmatpush.msra.mxu1 %v1888_v9  ;;  %1103 = vmatpush.msra.mxu0 %v924_v27 }
 0x108   :  { %1022 = vmatpush.msrb.mxu2 %v965_v24 }
 0x109   :  { %1148 = vmatpush.msra.mxu1 %v1890_v43  ;;  %1107 = vmatpush.msra.mxu0 %v930_v13 }
 0x10b   :  { %1150 = vmatpush.msra.mxu1 %v1902_v51  ;;  %1111 = vmatpush.msra.mxu0 %v936_v45 }
 0x10d   :  { %1152 = vmatpush.msra.mxu1 %v1913_v48  ;;  %1115 = vmatpush.msra.mxu0 %v942_v46 }
 0x10f   :  { %1154 = vmatpush.msra.mxu1 %v1947_v60  ;;  %1119 = vmatpush.msra.mxu0 %v948_v52 }
 0x111   :  { %1156 = vmatpush.msra.mxu1 %v1949_v31  ;;  %1123 = vmatpush.msra.mxu0 %v954_v55 }
 0x113   :  { %1158 = vmatpush.msra.mxu1 %v1955_v34  ;;  %1127 = vmatpush.msra.mxu0 %v960_v30 }
 0x115   :  { %1160 = vmatpush.msra.mxu1 %v1964_v16  ;;  %1131 = vmatpush.msra.mxu0 %v966_v44 }
 0x117   :  { %1162 = vmatpush.msra.mxu1 %v1974_v61 }
 0x119   :  { %1164 = vmatpush.msra.mxu1 %v859_v32 }
 0x11b   :  { %1166 = vmatpush.msra.mxu1 %v861_v18 }
 0x11d   :  { %1168 = vmatpush.msra.mxu1 %v863_v6 }
 0x160   :  { %v664_v43 = vpop.f32.mrf.mxu0 }
 0x162   :  { %v703_v19 = vpop.f32.mrf.mxu1 }
 0x164   :  { %v610_v25 = vpop.f32.mrf.mxu3 }
 0x16c   :  { %v509_v39 = vpop.f32.mrf.mxu2  ;;  %v809_v17 = vpop.f32.mrf.mxu3 }
 0x16d   :  { %v510_v41 = vadd.f32 %v1202_v4, %v509_v39 }
 0x16f   :  { %v611_v9 = vadd.f32 %v610_v25, %v510_v41 }
 0x171   :  { %v665_v57 = vadd.f32 %v664_v43, %v611_v9 }
 0x173   :  { %v704_v11 = vadd.f32 %v703_v19, %v665_v57 }
 0x174   :  { %v772_v51 = vpop.f32.mrf.mxu2 }
 0x175   :  { %v773_v37 = vadd.f32 %v772_v51, %v704_v11 }
 0x177   :  { %v810_v38 = vadd.f32 %v809_v17, %v773_v37 }
 0x179   :  { %v812_v48 = vmax.f32 %v810_v38, 0.0 }
 0x17b   :  { %v865_v22 = vand.u32 4294901760, %v812_v48 }
 0x17d   :  { %v866_v47 = vsub.f32 %v812_v48, %v865_v22  ;;  %971 = vmatmul.f32.vlgmr.msrb.gmra.mxu1 %v865_v22 }
 0x17f   :  { %1025 = vmatmul.f32.vlgmr.msrb.gmra.mxu2 %v866_v47  ;;  %v867_v14 = vand.u32 4294901760, %v866_v47 }
 0x181   :  { %1064 = vmatmul.f32.vlgmr.msrb.gmra.mxu3 %v867_v14  ;;  %v868_v3 = vsub.f32 %v866_v47, %v867_v14 }
 0x183   :  { %v869_v42 = vand.u32 4294901760, %v868_v3 }
 0x185   :  { %870 = vmatmul.f32.vlgmr.msrb.gmra.mxu0 %v869_v42  ;;  %1170 = vmatmul.f32.vlgmr.msra.gmra.mxu1 %v865_v22 }
 0x18d   :  { %1133 = vmatmul.f32.vlgmr.msra.gmra.mxu0 %v865_v22 }
 0x1fa   :  { %v972_v63 = vpop.f32.mrf.mxu1 }
 0x202   :  { %v871_v28 = vpop.f32.mrf.mxu0  ;;  %v1026_v31 = vpop.f32.mrf.mxu2 }
 0x203   :  { %v872_v54 = vadd.f32 %v1203_v49, %v871_v28  ;;  %v1171_v27 = vpop.f32.mrf.mxu1 }
 0x204   :  { %v1065_v34 = vpop.f32.mrf.mxu3 }
 0x205   :  { %v973_v60 = vadd.f32 %v972_v63, %v872_v54 }
 0x207   :  { %v1027_v1 = vadd.f32 %v1026_v31, %v973_v60 }
 0x209   :  { %v1066_v15 = vadd.f32 %v1065_v34, %v1027_v1 }
 0x20a   :  { %v1134_v23 = vpop.f32.mrf.mxu0 }
 0x20b   :  { %v1135_v16 = vadd.f32 %v1134_v23, %v1066_v15 }
 0x20d   :  { %v1172_v59 = vadd.f32 %v1171_v27, %v1135_v16 }
 0x20f   :  { %1174 = vst [vmem:[#allocation10] sm:$0xff] %v1172_v59 }
 0x210   :  { %1185 = dma.vmem_to_hbm [thread:$0]  %s1181_s24, 128, %s1183_s27, [#allocation4]  }
 0x211   :  { %1330 = dma.done.wait [#allocation4], 128  }
 0x212   :  { %1331 = vsyncadd [#allocation4], 4294967168 }
 0x213   :  { %1190 = vsyncpa [#allocation3], 1 }
 0x214   :  { %1191 = vsyncpa [#allocation6], 1 }
 0x215   :  { %1192 = vsyncpa [#allocation9], 1 }
 0x216   :  { %1193 = vsyncpa [#allocation4], 1 }

// kernel: tpu_custom_call.1
= control target key start
LH: loop header
LB: loop body
LE: loop exit
PB: predicated region body
PF: predicated region fallthrough
CT: control target
= control target key end

     0   :  { %12 = vsyncpa [#allocation3], 0  ;;  %s2084_s0 = inlined_call_operand.hbm [shape: f32[8,128], index: 0, kind: input, shape index: {}]   ;;  %s2085_s1 = inlined_call_operand.hbm [shape: f32[128,128], index: 1, kind: input, shape index: {}]   ;;  %s2086_s2 = inlined_call_operand.vmem [shape: f32[1,128], index: 2, kind: input, shape index: {}]   ;;  %s2087_s3 = inlined_call_operand.hbm [shape: f32[128,128], index: 3, kind: input, shape index: {}]   ;;  %s2088_s4 = inlined_call_operand.vmem [shape: f32[1,128], index: 4, kind: input, shape index: {}]   ;;  %s2089_s5 = inlined_call_operand.hbm [shape: f32[128,128], index: 5, kind: input, shape index: {}]   ;;  %s2090_s6 = inlined_call_operand.vmem [shape: f32[1,128], index: 6, kind: input, shape index: {}]   ;;  %s2091_s7 = inlined_call_operand.hbm [shape: f32[8,128], index: 7, kind: output, shape index: {}]  }
   0x1   :  { %13 = vsyncpa [#allocation6], 0 }
   0x2   :  { %14 = vsyncpa [#allocation9], 0  ;;  %s31_s26 = sshll.u32 %s2085_s1, 4  ;;  %s32_s26 = int_to_ptr.hbm [resolvable:$true] %s31_s26 }
   0x3   :  { %15 = vsyncpa [#allocation4], 0  ;;  %s1332_s27 = smov [#allocation5]   ;;  %s21_s8 = sshll.u32 %s2084_s0, 4  ;;  %s22_s8 = int_to_ptr.hbm [resolvable:$true] %s21_s8 }
   0x4   :  { %s33_s28 = sshll.u32 %s1332_s27, 4  ;;  %s1333_s9 = smov 128   ;;  %s34_s28 = int_to_ptr.vmem [resolvable:$true] %s33_s28 }
   0x5   :  { %s1334_s10 = smov 8   ;;  %s1335_s11 = smov [#allocation2]  }
   0x6   :  { %39 = dma.hbm_to_vmem [thread:$0]  %s32_s26, 2048, %s34_s28, [#allocation6], %s1333_s9, %s1333_s9, %s1334_s10  }
   0x7   :  { %s23_s12 = sshll.u32 %s1335_s11, 4  ;;  %s46_s15 = sshll.u32 %s2087_s3, 4  ;;  %s24_s12 = int_to_ptr.vmem [resolvable:$true] %s23_s12  ;;  %s47_s15 = int_to_ptr.hbm [resolvable:$true] %s46_s15 }
   0x8   :  { %26 = dma.hbm_to_vmem [thread:$0]  %s22_s8, 128, %s24_s12, [#allocation3]  }
   0x9   :  { %s61_s17 = sshll.u32 %s2089_s5, 4  ;;  %s1336_s18 = smov [#allocation7]   ;;  %s62_s17 = int_to_ptr.hbm [resolvable:$true] %s61_s17 }
   0xa   :  { %s48_s19 = sshll.u32 %s1336_s18, 4  ;;  %s1337_s0 = smov [#allocation8]   ;;  %s49_s19 = int_to_ptr.vmem [resolvable:$true] %s48_s19 }
   0xb   :  { %54 = dma.hbm_to_vmem [thread:$0]  %s47_s15, 2048, %s49_s19, [#allocation6], %s1333_s9, %s1333_s9, %s1334_s10  }
   0xc   :  { %s63_s20 = sshll.u32 %s1337_s0, 4  ;;  %s64_s20 = int_to_ptr.vmem [resolvable:$true] %s63_s20 }
   0xd   :  { %69 = dma.hbm_to_vmem [thread:$0]  %s62_s17, 2048, %s64_s20, [#allocation9], %s1333_s9, %s1333_s9, %s1334_s10  }
   0xe   :  { %1324 = dma.done.wait [#allocation3], 128  }
   0xf   :  { %1325 = vsyncadd [#allocation3], 4294967168 }
  0x10   :  { %1326 = dma.done.wait [#allocation6], 4096  }
  0x11   :  { %1327 = vsyncadd [#allocation6], 4294963200 }
  0x12   :  { %1328 = dma.done.wait [#allocation9], 2048  }
  0x13   :  { %1329 = vsyncadd [#allocation9], 4294965248  ;;  %v104_v0 = vld [vmem:[#allocation5 + $0x78] sm:$0xff]  ;;  %v103_v1 = vld [vmem:[#allocation5 + $0x70] sm:$0xff]  ;;  %s1338_s23 = smov [#allocation10]   ;;  %s1182_s27 = sshll.u32 %s2091_s7, 4  ;;  %s1183_s27 = int_to_ptr.hbm [resolvable:$true] %s1182_s27 }
  0x14   :  { %v102_v2 = vld [vmem:[#allocation5 + $0x68] sm:$0xff]  ;;  %v1391_v3 = vand.u32 4294901760, %v104_v0  ;;  %v1393_v4 = vand.u32 4294901760, %v103_v1  ;;  %v101_v6 = vld [vmem:[#allocation5 + $0x60] sm:$0xff]  ;;  %v100_v7 = vld [vmem:[#allocation5 + $0x58] sm:$0xff]  ;;  %s1180_s24 = sshll.u32 %s1338_s23, 4  ;;  %s1181_s24 = int_to_ptr.vmem [resolvable:$true] %s1180_s24 }
  0x15   :  { %v1395_v5 = vand.u32 4294901760, %v102_v2  ;;  %v99_v8 = vld [vmem:[#allocation5 + $0x50] sm:$0xff]  ;;  %v1397_v9 = vand.u32 4294901760, %v101_v6  ;;  %v1399_v10 = vand.u32 4294901760, %v100_v7  ;;  %v98_v12 = vld [vmem:[#allocation5 + $0x48] sm:$0xff]  ;;  %v97_v13 = vld [vmem:[#allocation5 + $0x40] sm:$0xff] }
  0x16   :  { %v1401_v11 = vand.u32 4294901760, %v99_v8  ;;  %110 = vmatpush.msra.mxu0 %v1391_v3  ;;  %v1405_v14 = vsub.f32 %v104_v0, %v1391_v3  ;;  %v1408_v15 = vsub.f32 %v103_v1, %v1393_v4  ;;  %v1413_v17 = vand.u32 4294901760, %v98_v12  ;;  %306 = vmatpush.msra.mxu3 %v1391_v3  ;;  %v96_v21 = vld [vmem:[#allocation5 + $0x38] sm:$0xff]  ;;  %v95_v34 = vld [vmem:[#allocation5 + $0x30] sm:$0xff]  ;;  %v94_v35 = vld [vmem:[#allocation5 + $0x28] sm:$0xff] }
  0x17   :  { %v1411_v16 = vsub.f32 %v102_v2, %v1395_v5  ;;  %v1417_v18 = vsub.f32 %v101_v6, %v1397_v9  ;;  %v1420_v19 = vsub.f32 %v100_v7, %v1399_v10  ;;  %v1422_v20 = vand.u32 4294901760, %v97_v13  ;;  %v93_v42 = vld [vmem:[#allocation5 + $0x20] sm:$0xff]  ;;  %v92_v47 = vld [vmem:[#allocation5 + $0x18] sm:$0xff]  ;;  %v91_v53 = vld [vmem:[#allocation5 + $0x10] sm:$0xff] }
  0x18   :  { %112 = vmatpush.msra.mxu0 %v1393_v4  ;;  %v152_v22 = vand.u32 4294901760, %v1405_v14  ;;  %v158_v23 = vand.u32 4294901760, %v1408_v15  ;;  %v1429_v25 = vsub.f32 %v99_v8, %v1401_v11  ;;  %253 = vmatpush.msra.mxu2 %v1405_v14  ;;  %v1435_v28 = vsub.f32 %v98_v12, %v1413_v17  ;;  %v90_v61 = vld [vmem:[#allocation5 + $0x8] sm:$0xff]  ;;  %v89_v2 = vld [vmem:[#allocation5] sm:$0xff] }
  0x19   :  { %v164_v24 = vand.u32 4294901760, %v1411_v16  ;;  %v170_v26 = vand.u32 4294901760, %v1417_v18  ;;  %v176_v27 = vand.u32 4294901760, %v1420_v19  ;;  %308 = vmatpush.msra.mxu3 %v1393_v4  ;;  %v1448_v32 = vand.u32 4294901760, %v96_v21 }
  0x1a   :  { %v153_v29 = vsub.f32 %v1405_v14, %v152_v22  ;;  %114 = vmatpush.msra.mxu0 %v1395_v5  ;;  %v159_v30 = vsub.f32 %v1408_v15, %v158_v23  ;;  %256 = vmatpush.msra.mxu2 %v1408_v15  ;;  %v1452_v33 = vsub.f32 %v97_v13, %v1422_v20  ;;  %v182_v39 = vand.u32 4294901760, %v1429_v25  ;;  %v466_v14 = vld [vmem:[#allocation7 + $0x78] sm:$0xff] }
  0x1b   :  { %v165_v31 = vsub.f32 %v1411_v16, %v164_v24  ;;  %310 = vmatpush.msra.mxu3 %v1395_v5  ;;  %v171_v38 = vsub.f32 %v1417_v18, %v170_v26  ;;  %v177_v40 = vsub.f32 %v1420_v19, %v176_v27  ;;  %v188_v41 = vand.u32 4294901760, %v1435_v28 }
  0x1c   :  { %v154_v36 = vand.u32 4294901760, %v153_v29  ;;  %v160_v37 = vand.u32 4294901760, %v159_v30  ;;  %116 = vmatpush.msra.mxu0 %v1397_v9  ;;  %259 = vmatpush.msra.mxu2 %v1411_v16  ;;  %v1467_v44 = vand.u32 4294901760, %v95_v34  ;;  %v1470_v45 = vsub.f32 %v96_v21, %v1448_v32  ;;  %v88_v29 = vld [vmem:[#allocation2] sm:$0xff] }
  0x1d   :  { %312 = vmatpush.msra.mxu3 %v1397_v9  ;;  %v166_v43 = vand.u32 4294901760, %v165_v31  ;;  %v1472_v46 = vand.u32 4294901760, %v94_v35  ;;  %v194_v48 = vand.u32 4294901760, %v1452_v33  ;;  %v172_v49 = vand.u32 4294901760, %v171_v38 }
  0x1e   :  { %155 = vmatpush.msra.mxu1 %v154_v36  ;;  %118 = vmatpush.msra.mxu0 %v1399_v10  ;;  %v183_v50 = vsub.f32 %v1429_v25, %v182_v39  ;;  %v1482_v51 = vsub.f32 %v95_v34, %v1467_v44  ;;  %v1484_v52 = vand.u32 4294901760, %v93_v42  ;;  %v1486_v54 = vand.u32 4294901760, %v92_v47 }
  0x1f   :  { %262 = vmatpush.msra.mxu2 %v1417_v18  ;;  %314 = vmatpush.msra.mxu3 %v1399_v10  ;;  %v178_v55 = vand.u32 4294901760, %v177_v40  ;;  %v189_v56 = vsub.f32 %v1435_v28, %v188_v41  ;;  %v200_v57 = vand.u32 4294901760, %v1470_v45  ;;  %v1496_v58 = vsub.f32 %v94_v35, %v1472_v46 }
  0x20   :  { %161 = vmatpush.msra.mxu1 %v160_v37  ;;  %120 = vmatpush.msra.mxu0 %v1401_v11  ;;  %v195_v59 = vsub.f32 %v1452_v33, %v194_v48  ;;  %v1501_v60 = vand.u32 4294901760, %v91_v53  ;;  %v184_v62 = vand.u32 4294901760, %v183_v50  ;;  %v206_v63 = vand.u32 4294901760, %v1482_v51 }
  0x21   :  { %265 = vmatpush.msra.mxu2 %v1420_v19  ;;  %316 = vmatpush.msra.mxu3 %v1401_v11  ;;  %v1508_v0 = vsub.f32 %v93_v42, %v1484_v52  ;;  %v1511_v1 = vsub.f32 %v92_v47, %v1486_v54  ;;  %v190_v6 = vand.u32 4294901760, %v189_v56  ;;  %v201_v7 = vsub.f32 %v1470_v45, %v200_v57  ;;  %v459_v19 = vld [vmem:[#allocation7 + $0x40] sm:$0xff] }
  0x22   :  { %167 = vmatpush.msra.mxu1 %v166_v43  ;;  %122 = vmatpush.msra.mxu0 %v1413_v17  ;;  %v212_v8 = vand.u32 4294901760, %v1496_v58  ;;  %v1520_v12 = vand.u32 4294901760, %v90_v61  ;;  %v196_v13 = vand.u32 4294901760, %v195_v59  ;;  %v1523_v21 = vsub.f32 %v91_v53, %v1501_v60 }
  0x23   :  { %268 = vmatpush.msra.mxu2 %v1429_v25  ;;  %318 = vmatpush.msra.mxu3 %v1413_v17  ;;  %v207_v30 = vsub.f32 %v1482_v51, %v206_v63  ;;  %v218_v31 = vand.u32 4294901760, %v1508_v0  ;;  %v1532_v34 = vand.u32 4294901760, %v89_v2  ;;  %v1534_v35 = vand.u32 4294901760, %v88_v29 }
  0x24   :  { %173 = vmatpush.msra.mxu1 %v172_v49  ;;  %124 = vmatpush.msra.mxu0 %v1422_v20  ;;  %v224_v36 = vand.u32 4294901760, %v1511_v1  ;;  %v202_v37 = vand.u32 4294901760, %v201_v7  ;;  %v213_v38 = vsub.f32 %v1496_v58, %v212_v8  ;;  %v1544_v40 = vsub.f32 %v90_v61, %v1520_v12 }
  0x25   :  { %271 = vmatpush.msra.mxu2 %v1435_v28  ;;  %320 = vmatpush.msra.mxu3 %v1422_v20  ;;  %v142_v42 = vsub.f32 %v88_v29, %v1534_v35  ;;  %v208_v43 = vand.u32 4294901760, %v207_v30  ;;  %v219_v47 = vsub.f32 %v1508_v0, %v218_v31  ;;  %v230_v49 = vand.u32 4294901760, %v1523_v21 }
  0x26   :  { %179 = vmatpush.msra.mxu1 %v178_v55  ;;  %126 = vmatpush.msra.mxu0 %v1448_v32  ;;  %v1555_v50 = vsub.f32 %v89_v2, %v1532_v34  ;;  %v214_v53 = vand.u32 4294901760, %v213_v38  ;;  %v225_v55 = vsub.f32 %v1511_v1, %v224_v36  ;;  %v236_v56 = vand.u32 4294901760, %v1544_v40 }
  0x27   :  { %274 = vmatpush.msra.mxu2 %v1452_v33  ;;  %322 = vmatpush.msra.mxu3 %v1448_v32  ;;  %v143_v59 = vand.u32 4294901760, %v142_v42  ;;  %v220_v61 = vand.u32 4294901760, %v219_v47  ;;  %v464_v47 = vld [vmem:[#allocation7 + $0x68] sm:$0xff]  ;;  %v1597_v15 = vand.u32 4294901760, %v466_v14  ;;  %v458_v33 = vld [vmem:[#allocation7 + $0x38] sm:$0xff] }
  0x28   :  { %185 = vmatpush.msra.mxu1 %v184_v62  ;;  %128 = vmatpush.msra.mxu0 %v1467_v44  ;;  %v231_v62 = vsub.f32 %v1523_v21, %v230_v49  ;;  %v242_v2 = vand.u32 4294901760, %v1555_v50  ;;  %v237_v7 = vsub.f32 %v1544_v40, %v236_v56  ;;  %v1601_v16 = vand.u32 4294901760, %v464_v47 }
  0x29   :  { %277 = vmatpush.msra.mxu2 %v1470_v45  ;;  %324 = vmatpush.msra.mxu3 %v1467_v44  ;;  %v1676_v45 = vand.u32 4294901760, %v458_v33 }
  0x2a   :  { %191 = vmatpush.msra.mxu1 %v190_v6  ;;  %130 = vmatpush.msra.mxu0 %v1472_v46  ;;  %v226_v6 = vand.u32 4294901760, %v225_v55  ;;  %v232_v29 = vand.u32 4294901760, %v231_v62  ;;  %v243_v30 = vsub.f32 %v1555_v50, %v242_v2 }
  0x2b   :  { %280 = vmatpush.msra.mxu2 %v1482_v51  ;;  %326 = vmatpush.msra.mxu3 %v1472_v46  ;;  %v1691_v51 = vsub.f32 %v458_v33, %v1676_v45 }
  0x2c   :  { %197 = vmatpush.msra.mxu1 %v196_v13  ;;  %132 = vmatpush.msra.mxu0 %v1484_v52  ;;  %v144_v13 = vsub.f32 %v142_v42, %v143_v59 }
  0x2d   :  { %283 = vmatpush.msra.mxu2 %v1496_v58  ;;  %328 = vmatpush.msra.mxu3 %v1484_v52 }
  0x2e   :  { %203 = vmatpush.msra.mxu1 %v202_v37  ;;  %134 = vmatpush.msra.mxu0 %v1486_v54  ;;  %v238_v37 = vand.u32 4294901760, %v237_v7  ;;  %v145_v38 = vand.u32 4294901760, %v144_v13  ;;  %v1637_v13 = vand.u32 4294901760, %v459_v19 }
  0x2f   :  { %286 = vmatpush.msra.mxu2 %v1508_v0  ;;  %330 = vmatpush.msra.mxu3 %v1486_v54  ;;  %v452_v0 = vld [vmem:[#allocation7 + $0x8] sm:$0xff] }
  0x30   :  { %209 = vmatpush.msra.mxu1 %v208_v43  ;;  %136 = vmatpush.msra.mxu0 %v1501_v60  ;;  %v244_v43 = vand.u32 4294901760, %v243_v30 }
  0x31   :  { %289 = vmatpush.msra.mxu2 %v1511_v1  ;;  %332 = vmatpush.msra.mxu3 %v1501_v60  ;;  %v451_v1 = vld [vmem:[#allocation7] sm:$0xff] }
  0x32   :  { %215 = vmatpush.msra.mxu1 %v214_v53  ;;  %138 = vmatpush.msra.mxu0 %v1520_v12  ;;  %v461_v53 = vld [vmem:[#allocation7 + $0x50] sm:$0xff] }
  0x33   :  { %292 = vmatpush.msra.mxu2 %v1523_v21  ;;  %334 = vmatpush.msra.mxu3 %v1520_v12  ;;  %v1608_v55 = vand.u32 4294901760, %v461_v53 }
  0x34   :  { %221 = vmatpush.msra.mxu1 %v220_v61  ;;  %140 = vmatpush.msra.mxu0 %v1532_v34  ;;  %v1620_v61 = vsub.f32 %v464_v47, %v1601_v16 }
  0x35   :  { %295 = vmatpush.msra.mxu2 %v1544_v40  ;;  %336 = vmatpush.msra.mxu3 %v1532_v34  ;;  %v1642_v30 = vsub.f32 %v461_v53, %v1608_v55 }
  0x36   :  { %347 = vmatpush.msrb.mxu0 %v152_v22  ;;  %227 = vmatpush.msra.mxu1 %v226_v6  ;;  %v465_v22 = vld [vmem:[#allocation7 + $0x70] sm:$0xff]  ;;  %v526_v7 = vand.u32 4294901760, %v1620_v61 }
  0x37   :  { %298 = vmatpush.msra.mxu2 %v1555_v50  ;;  %340 = vmatmul.f32.vlgmr.msra.gmra.mxu3 %v143_v59 }
  0x38   :  { %351 = vmatpush.msrb.mxu0 %v158_v23  ;;  %233 = vmatpush.msra.mxu1 %v232_v29  ;;  %v1599_v23 = vand.u32 4294901760, %v465_v22 }
  0x39   :  { %301 = vmatmul.f32.vlgmr.msra.gmra.mxu2 %v142_v42  ;;  %146 = vmatmul.f32.vlgmr.msra.gmra.mxu0 %v145_v38  ;;  %v462_v42 = vld [vmem:[#allocation7 + $0x58] sm:$0xff] }
  0x3a   :  { %355 = vmatpush.msrb.mxu0 %v164_v24  ;;  %239 = vmatpush.msra.mxu1 %v238_v37  ;;  %v463_v24 = vld [vmem:[#allocation7 + $0x60] sm:$0xff]  ;;  %v1617_v59 = vsub.f32 %v465_v22, %v1599_v23  ;;  %v527_v37 = vsub.f32 %v1620_v61, %v526_v7 }
  0x3b   :  { %v1604_v18 = vand.u32 4294901760, %v463_v24  ;;  %472 = vmatpush.msrb.mxu2 %v1597_v15 }
  0x3c   :  { %359 = vmatpush.msrb.mxu0 %v170_v26  ;;  %245 = vmatpush.msra.mxu1 %v244_v43  ;;  %v1606_v26 = vand.u32 4294901760, %v462_v42  ;;  %v1665_v43 = vsub.f32 %v459_v19, %v1637_v13  ;;  %v528_v53 = vand.u32 4294901760, %v527_v37 }
  0x3d   :  { %247 = vmatmul.f32.vlgmr.msra.gmra.mxu1 %v1534_v35  ;;  %v1625_v6 = vsub.f32 %v463_v24, %v1604_v18  ;;  %474 = vmatpush.msrb.mxu2 %v1599_v23  ;;  %v544_v24 = vand.u32 4294901760, %v1642_v30 }
  0x3e   :  { %414 = vmatpush.msrb.mxu1 %v1391_v3  ;;  %363 = vmatpush.msrb.mxu0 %v176_v27  ;;  %v460_v3 = vld [vmem:[#allocation7 + $0x48] sm:$0xff]  ;;  %v1614_v27 = vsub.f32 %v466_v14, %v1597_v15 }
  0x3f   :  { %v1622_v62 = vand.u32 4294901760, %v460_v3  ;;  %v532_v29 = vand.u32 4294901760, %v1625_v6  ;;  %476 = vmatpush.msrb.mxu2 %v1601_v16  ;;  %v456_v14 = vld [vmem:[#allocation7 + $0x28] sm:$0xff] }
  0x40   :  { %416 = vmatpush.msrb.mxu1 %v1393_v4  ;;  %367 = vmatpush.msrb.mxu0 %v182_v39  ;;  %v1629_v4 = vsub.f32 %v462_v42, %v1606_v26  ;;  %v514_v25 = vand.u32 4294901760, %v1614_v27  ;;  %v520_v39 = vand.u32 4294901760, %v1617_v59  ;;  %v455_v42 = vld [vmem:[#allocation7 + $0x20] sm:$0xff]  ;;  %v1684_v19 = vand.u32 4294901760, %v456_v14 }
  0x41   :  { %v533_v47 = vsub.f32 %v1625_v6, %v532_v29  ;;  %478 = vmatpush.msrb.mxu2 %v1604_v18 }
  0x42   :  { %418 = vmatpush.msrb.mxu1 %v1395_v5  ;;  %371 = vmatpush.msrb.mxu0 %v188_v41  ;;  %v515_v5 = vsub.f32 %v1614_v27, %v514_v25  ;;  %v521_v28 = vsub.f32 %v1617_v59, %v520_v39  ;;  %v1654_v41 = vsub.f32 %v460_v3, %v1622_v62 }
  0x43   :  { %480 = vmatpush.msrb.mxu2 %v1606_v26 }
  0x44   :  { %420 = vmatpush.msrb.mxu1 %v1397_v9  ;;  %375 = vmatpush.msrb.mxu0 %v194_v48  ;;  %v538_v9 = vand.u32 4294901760, %v1629_v4  ;;  %v457_v48 = vld [vmem:[#allocation7 + $0x30] sm:$0xff]  ;;  %v516_v38 = vand.u32 4294901760, %v515_v5  ;;  %v522_v22 = vand.u32 4294901760, %v521_v28  ;;  %v534_v5 = vand.u32 4294901760, %v533_v47 }
  0x45   :  { %v545_v28 = vsub.f32 %v1642_v30, %v544_v24  ;;  %482 = vmatpush.msrb.mxu2 %v1608_v55 }
  0x46   :  { %422 = vmatpush.msrb.mxu1 %v1399_v10  ;;  %379 = vmatpush.msrb.mxu0 %v200_v57  ;;  %v550_v10 = vand.u32 4294901760, %v1654_v41  ;;  %v1678_v57 = vand.u32 4294901760, %v457_v48  ;;  %v539_v3 = vsub.f32 %v1629_v4, %v538_v9 }
  0x47   :  { %517 = vmatpush.msrb.mxu3 %v516_v38  ;;  %v562_v38 = vand.u32 4294901760, %v1691_v51  ;;  %484 = vmatpush.msrb.mxu2 %v1622_v62 }
  0x48   :  { %424 = vmatpush.msrb.mxu1 %v1401_v11  ;;  %383 = vmatpush.msrb.mxu0 %v206_v63  ;;  %v556_v11 = vand.u32 4294901760, %v1665_v43  ;;  %v454_v63 = vld [vmem:[#allocation7 + $0x18] sm:$0xff]  ;;  %v1698_v37 = vsub.f32 %v457_v48, %v1678_v57  ;;  %v551_v58 = vsub.f32 %v1654_v41, %v550_v10  ;;  %v540_v33 = vand.u32 4294901760, %v539_v3 }
  0x49   :  { %523 = vmatpush.msrb.mxu3 %v522_v22  ;;  %v1711_v48 = vsub.f32 %v456_v14, %v1684_v19  ;;  %v1713_v22 = vand.u32 4294901760, %v454_v63  ;;  %486 = vmatpush.msrb.mxu2 %v1637_v13 }
  0x4a   :  { %426 = vmatpush.msrb.mxu1 %v1413_v17  ;;  %387 = vmatpush.msrb.mxu0 %v212_v8  ;;  %v1700_v17 = vand.u32 4294901760, %v455_v42  ;;  %v453_v8 = vld [vmem:[#allocation7 + $0x10] sm:$0xff]  ;;  %v568_v47 = vand.u32 4294901760, %v1698_v37 }
  0x4b   :  { %529 = vmatpush.msrb.mxu3 %v528_v53  ;;  %v1726_v53 = vand.u32 4294901760, %v453_v8  ;;  %v574_v3 = vand.u32 4294901760, %v1711_v48  ;;  %488 = vmatpush.msrb.mxu2 %v1676_v45 }
  0x4c   :  { %428 = vmatpush.msrb.mxu1 %v1422_v20  ;;  %391 = vmatpush.msrb.mxu0 %v218_v31  ;;  %v557_v20 = vsub.f32 %v1665_v43, %v556_v11  ;;  %v546_v31 = vand.u32 4294901760, %v545_v28  ;;  %v1724_v14 = vsub.f32 %v455_v42, %v1700_v17  ;;  %v1737_v42 = vsub.f32 %v454_v63, %v1713_v22 }
  0x4d   :  { %535 = vmatpush.msrb.mxu3 %v534_v5  ;;  %v1739_v5 = vand.u32 4294901760, %v452_v0  ;;  %v569_v21 = vsub.f32 %v1698_v37, %v568_v47  ;;  %490 = vmatpush.msrb.mxu2 %v1678_v57  ;;  %v1750_v63 = vsub.f32 %v453_v8, %v1726_v53  ;;  %v1752_v28 = vand.u32 4294901760, %v451_v1 }
  0x4e   :  { %430 = vmatpush.msrb.mxu1 %v1448_v32  ;;  %395 = vmatpush.msrb.mxu0 %v224_v36  ;;  %v552_v32 = vand.u32 4294901760, %v551_v58  ;;  %v563_v36 = vsub.f32 %v1691_v51, %v562_v38  ;;  %v575_v40 = vsub.f32 %v1711_v48, %v574_v3 }
  0x4f   :  { %541 = vmatpush.msrb.mxu3 %v540_v33  ;;  %v1763_v58 = vsub.f32 %v452_v0, %v1739_v5  ;;  %492 = vmatpush.msrb.mxu2 %v1684_v19  ;;  %v1773_v8 = vsub.f32 %v451_v1, %v1752_v28 }
  0x50   :  { %432 = vmatpush.msrb.mxu1 %v1467_v44  ;;  %399 = vmatpush.msrb.mxu0 %v230_v49  ;;  %v558_v44 = vand.u32 4294901760, %v557_v20  ;;  %v580_v49 = vand.u32 4294901760, %v1724_v14 }
  0x51   :  { %547 = vmatpush.msrb.mxu3 %v546_v31  ;;  %v598_v20 = vand.u32 4294901760, %v1763_v58  ;;  %494 = vmatpush.msrb.mxu2 %v1700_v17  ;;  %v604_v31 = vand.u32 4294901760, %v1773_v8 }
  0x52   :  { %434 = vmatpush.msrb.mxu1 %v1472_v46  ;;  %403 = vmatpush.msrb.mxu0 %v236_v56  ;;  %v564_v46 = vand.u32 4294901760, %v563_v36  ;;  %v586_v56 = vand.u32 4294901760, %v1737_v42  ;;  %v581_v50 = vsub.f32 %v1724_v14, %v580_v49 }
  0x53   :  { %553 = vmatpush.msrb.mxu3 %v552_v32  ;;  %496 = vmatpush.msrb.mxu2 %v1713_v22  ;;  %v599_v32 = vsub.f32 %v1763_v58, %v598_v20 }
  0x54   :  { %436 = vmatpush.msrb.mxu1 %v1484_v52  ;;  %407 = vmatpush.msrb.mxu0 %v242_v2  ;;  %v570_v52 = vand.u32 4294901760, %v569_v21  ;;  %v592_v2 = vand.u32 4294901760, %v1750_v63  ;;  %v587_v33 = vsub.f32 %v1737_v42, %v586_v56  ;;  %v582_v0 = vand.u32 4294901760, %v581_v50 }
  0x55   :  { %409 = vmatmul.f32.vlgmr.msrb.gmra.mxu0 %v1534_v35  ;;  %559 = vmatpush.msrb.mxu3 %v558_v44 }
  0x56   :  { %438 = vmatpush.msrb.mxu1 %v1486_v54  ;;  %615 = vmatpush.msra.mxu0 %v1614_v27  ;;  %v576_v54 = vand.u32 4294901760, %v575_v40  ;;  %v819_v40 = vld [vmem:[#allocation8 + $0x30] sm:$0xff] }
  0x57   :  { %565 = vmatpush.msrb.mxu3 %v564_v46  ;;  %498 = vmatpush.msrb.mxu2 %v1726_v53  ;;  %v820_v46 = vld [vmem:[#allocation8 + $0x38] sm:$0xff] }
  0x58   :  { %440 = vmatpush.msrb.mxu1 %v1501_v60  ;;  %618 = vmatpush.msra.mxu0 %v1617_v59  ;;  %v593_v60 = vsub.f32 %v1750_v63, %v592_v2 }
  0x59   :  { %571 = vmatpush.msrb.mxu3 %v570_v52  ;;  %500 = vmatpush.msrb.mxu2 %v1739_v5 }
  0x5a   :  { %442 = vmatpush.msrb.mxu1 %v1520_v12  ;;  %621 = vmatpush.msra.mxu0 %v1620_v61  ;;  %v588_v12 = vand.u32 4294901760, %v587_v33  ;;  %v594_v1 = vand.u32 4294901760, %v593_v60  ;;  %v828_v61 = vld [vmem:[#allocation8 + $0x78] sm:$0xff]  ;;  %v817_v33 = vld [vmem:[#allocation8 + $0x20] sm:$0xff]  ;;  %v1947_v60 = vand.u32 4294901760, %v820_v46 }
  0x5b   :  { %577 = vmatpush.msrb.mxu3 %v576_v54  ;;  %502 = vmatpush.msrb.mxu2 %v1752_v28 }
  0x5c   :  { %444 = vmatpush.msrb.mxu1 %v1532_v34  ;;  %624 = vmatpush.msra.mxu0 %v1625_v6  ;;  %v605_v34 = vsub.f32 %v1773_v8, %v604_v31  ;;  %v826_v6 = vld [vmem:[#allocation8 + $0x68] sm:$0xff] }
  0x5d   :  { %446 = vmatmul.f32.vlgmr.msrb.gmra.mxu1 %v1534_v35  ;;  %583 = vmatpush.msrb.mxu3 %v582_v0  ;;  %v600_v35 = vand.u32 4294901760, %v599_v32 }
  0x5e   :  { %668 = vmatpush.msra.mxu1 %v1597_v15  ;;  %627 = vmatpush.msra.mxu0 %v1629_v4  ;;  %v606_v36 = vand.u32 4294901760, %v605_v34  ;;  %v1880_v4 = vand.u32 4294901760, %v828_v61 }
  0x5f   :  { %589 = vmatpush.msrb.mxu3 %v588_v12  ;;  %709 = vmatpush.msra.mxu2 %v514_v25 }
  0x60   :  { %670 = vmatpush.msra.mxu1 %v1599_v23  ;;  %630 = vmatpush.msra.mxu0 %v1642_v30 }
  0x61   :  { %595 = vmatpush.msrb.mxu3 %v594_v1  ;;  %713 = vmatpush.msra.mxu2 %v520_v39  ;;  %v1884_v39 = vand.u32 4294901760, %v826_v6 }
  0x62   :  { %672 = vmatpush.msra.mxu1 %v1601_v16  ;;  %633 = vmatpush.msra.mxu0 %v1654_v41 }
  0x63   :  { %601 = vmatpush.msrb.mxu3 %v600_v35  ;;  %717 = vmatpush.msra.mxu2 %v526_v7  ;;  %v825_v7 = vld [vmem:[#allocation8 + $0x60] sm:$0xff]  ;;  %v816_v35 = vld [vmem:[#allocation8 + $0x18] sm:$0xff] }
  0x64   :  { %674 = vmatpush.msra.mxu1 %v1604_v18  ;;  %636 = vmatpush.msra.mxu0 %v1665_v43  ;;  %v1886_v41 = vand.u32 4294901760, %v825_v7 }
  0x65   :  { %607 = vmatpush.msrb.mxu3 %v606_v36  ;;  %721 = vmatpush.msra.mxu2 %v532_v29  ;;  %v823_v29 = vld [vmem:[#allocation8 + $0x50] sm:$0xff] }
  0x66   :  { %676 = vmatpush.msra.mxu1 %v1606_v26  ;;  %639 = vmatpush.msra.mxu0 %v1691_v51  ;;  %v1890_v43 = vand.u32 4294901760, %v823_v29 }
  0x67   :  { %776 = vmatpush.msra.mxu3 %v1597_v15  ;;  %725 = vmatpush.msra.mxu2 %v538_v9  ;;  %v1201_v15 = vld [vmem:[%s2086_s2] ss:$0 sm:$0xff] }
  0x68   :  { %678 = vmatpush.msra.mxu1 %v1608_v55  ;;  %642 = vmatpush.msra.mxu0 %v1698_v37  ;;  %v1905_v37 = vsub.f32 %v825_v7, %v1886_v41 }
  0x69   :  { %778 = vmatpush.msra.mxu3 %v1599_v23  ;;  %729 = vmatpush.msra.mxu2 %v544_v24  ;;  %v822_v24 = vld [vmem:[#allocation8 + $0x48] sm:$0xff] }
  0x6a   :  { %680 = vmatpush.msra.mxu1 %v1622_v62  ;;  %645 = vmatpush.msra.mxu0 %v1711_v48  ;;  %v1902_v51 = vand.u32 4294901760, %v822_v24 }
  0x6b   :  { %780 = vmatpush.msra.mxu3 %v1601_v16  ;;  %733 = vmatpush.msra.mxu2 %v550_v10  ;;  %v821_v10 = vld [vmem:[#allocation8 + $0x40] sm:$0xff] }
  0x6c   :  { %682 = vmatpush.msra.mxu1 %v1637_v13  ;;  %648 = vmatpush.msra.mxu0 %v1724_v14  ;;  %v1913_v48 = vand.u32 4294901760, %v821_v10 }
  0x6d   :  { %782 = vmatpush.msra.mxu3 %v1604_v18  ;;  %737 = vmatpush.msra.mxu2 %v556_v11  ;;  %v1899_v11 = vsub.f32 %v826_v6, %v1884_v39 }
  0x6e   :  { %684 = vmatpush.msra.mxu1 %v1676_v45  ;;  %651 = vmatpush.msra.mxu0 %v1737_v42  ;;  %v1921_v42 = vsub.f32 %v822_v24, %v1902_v51 }
  0x6f   :  { %784 = vmatpush.msra.mxu3 %v1606_v26  ;;  %741 = vmatpush.msra.mxu2 %v562_v38  ;;  %v1911_v38 = vsub.f32 %v823_v29, %v1890_v43  ;;  %v888_v14 = vand.u32 4294901760, %v1899_v11 }
  0x70   :  { %686 = vmatpush.msra.mxu1 %v1678_v57  ;;  %654 = vmatpush.msra.mxu0 %v1750_v63  ;;  %v912_v54 = vand.u32 4294901760, %v1921_v42 }
  0x71   :  { %786 = vmatpush.msra.mxu3 %v1608_v55  ;;  %745 = vmatpush.msra.mxu2 %v568_v47  ;;  %v889_v21 = vsub.f32 %v1899_v11, %v888_v14  ;;  %v906_v63 = vand.u32 4294901760, %v1911_v38 }
  0x72   :  { %688 = vmatpush.msra.mxu1 %v1684_v19  ;;  %657 = vmatpush.msra.mxu0 %v1763_v58 }
  0x73   :  { %788 = vmatpush.msra.mxu3 %v1622_v62  ;;  %749 = vmatpush.msra.mxu2 %v574_v3  ;;  %v827_v62 = vld [vmem:[#allocation8 + $0x70] sm:$0xff]  ;;  %v894_v3 = vand.u32 4294901760, %v1905_v37  ;;  %v907_v32 = vsub.f32 %v1911_v38, %v906_v63 }
  0x74   :  { %690 = vmatpush.msra.mxu1 %v1700_v17  ;;  %660 = vmatpush.msra.mxu0 %v1773_v8  ;;  %v1882_v25 = vand.u32 4294901760, %v827_v62 }
  0x75   :  { %790 = vmatpush.msra.mxu3 %v1637_v13  ;;  %753 = vmatpush.msra.mxu2 %v580_v49  ;;  %v824_v13 = vld [vmem:[#allocation8 + $0x58] sm:$0xff]  ;;  %v895_v50 = vsub.f32 %v1905_v37, %v894_v3  ;;  %v908_v6 = vand.u32 4294901760, %v907_v32 }
  0x76   :  { %692 = vmatpush.msra.mxu1 %v1713_v22  ;;  %v1888_v9 = vand.u32 4294901760, %v824_v13  ;;  %834 = vmatpush.msrb.mxu0 %v1880_v4 }
  0x77   :  { %792 = vmatpush.msra.mxu3 %v1676_v45  ;;  %757 = vmatpush.msra.mxu2 %v586_v56  ;;  %v896_v36 = vand.u32 4294901760, %v895_v50 }
  0x78   :  { %694 = vmatpush.msra.mxu1 %v1726_v53  ;;  %836 = vmatpush.msrb.mxu0 %v1882_v25 }
  0x79   :  { %794 = vmatpush.msra.mxu3 %v1678_v57  ;;  %761 = vmatpush.msra.mxu2 %v592_v2  ;;  %v1893_v57 = vsub.f32 %v828_v61, %v1880_v4  ;;  %v818_v2 = vld [vmem:[#allocation8 + $0x28] sm:$0xff]  ;;  %v1974_v61 = vand.u32 4294901760, %v816_v35 }
  0x7a   :  { %696 = vmatpush.msra.mxu1 %v1739_v5  ;;  %838 = vmatpush.msrb.mxu0 %v1884_v39  ;;  %v1955_v34 = vand.u32 4294901760, %v818_v2 }
  0x7b   :  { %796 = vmatpush.msra.mxu3 %v1684_v19  ;;  %765 = vmatpush.msra.mxu2 %v598_v20  ;;  %v1896_v19 = vsub.f32 %v827_v62, %v1882_v25  ;;  %v890_v20 = vand.u32 4294901760, %v889_v21 }
  0x7c   :  { %698 = vmatpush.msra.mxu1 %v1752_v28  ;;  %840 = vmatpush.msrb.mxu0 %v1886_v41 }
  0x7d   :  { %798 = vmatpush.msra.mxu3 %v1700_v17  ;;  %769 = vmatpush.msra.mxu2 %v604_v31  ;;  %v1908_v17 = vsub.f32 %v824_v13, %v1888_v9  ;;  %v882_v47 = vand.u32 4294901760, %v1896_v19  ;;  %v1949_v31 = vand.u32 4294901760, %v819_v40 }
  0x7e   :  { %842 = vmatpush.msrb.mxu0 %v1888_v9 }
  0x7f   :  { %800 = vmatpush.msra.mxu3 %v1713_v22  ;;  %v876_v22 = vand.u32 4294901760, %v1893_v57  ;;  %v883_v44 = vsub.f32 %v1896_v19, %v882_v47  ;;  %v900_v49 = vand.u32 4294901760, %v1908_v17 }
  0x80   :  { %844 = vmatpush.msrb.mxu0 %v1890_v43 }
  0x81   :  { %802 = vmatpush.msra.mxu3 %v1726_v53  ;;  %v884_v52 = vand.u32 4294901760, %v883_v44  ;;  %v901_v0 = vsub.f32 %v1908_v17, %v900_v49 }
  0x82   :  { %846 = vmatpush.msrb.mxu0 %v1902_v51 }
  0x83   :  { %804 = vmatpush.msra.mxu3 %v1739_v5  ;;  %v877_v5 = vsub.f32 %v1893_v57, %v876_v22 }
  0x84   :  { %848 = vmatpush.msrb.mxu0 %v1913_v48 }
  0x85   :  { %806 = vmatpush.msra.mxu3 %v1752_v28  ;;  %v1936_v28 = vsub.f32 %v821_v10, %v1913_v48  ;;  %v878_v58 = vand.u32 4294901760, %v877_v5 }
  0x86   :  { %850 = vmatpush.msrb.mxu0 %v1947_v60 }
  0x87   :  { %879 = vmatpush.msrb.mxu1 %v878_v58  ;;  %v918_v1 = vand.u32 4294901760, %v1936_v28 }
  0x88   :  { %852 = vmatpush.msrb.mxu0 %v1949_v31 }
  0x89   :  { %885 = vmatpush.msrb.mxu1 %v884_v52  ;;  %v919_v7 = vsub.f32 %v1936_v28, %v918_v1 }
  0x8a   :  { %854 = vmatpush.msrb.mxu0 %v1955_v34 }
  0x8b   :  { %891 = vmatpush.msrb.mxu1 %v890_v20  ;;  %v920_v44 = vand.u32 4294901760, %v919_v7 }
  0x8d   :  { %897 = vmatpush.msrb.mxu1 %v896_v36 }
  0xb6   :  { %v147_v23 = vpop.f32.mrf.mxu0 }
  0xb7   :  { %v148_v16 = vadd.f32 %v1201_v15, %v147_v23  ;;  %v1958_v15 = vsub.f32 %v820_v46, %v1947_v60  ;;  %v1962_v23 = vsub.f32 %v819_v40, %v1949_v31 }
  0xb9   :  { %v930_v13 = vand.u32 4294901760, %v1962_v23 }
  0xba   :  { %v248_v18 = vpop.f32.mrf.mxu1  ;;  %v341_v59 = vpop.f32.mrf.mxu3 }
  0xbb   :  { %v249_v26 = vadd.f32 %v248_v18, %v148_v16  ;;  %v1964_v16 = vand.u32 4294901760, %v817_v33  ;;  %v931_v21 = vsub.f32 %v1962_v23, %v930_v13 }
  0xbc   :  { %v302_v55 = vpop.f32.mrf.mxu2 }
  0xbd   :  { %v303_v27 = vadd.f32 %v302_v55, %v249_v26  ;;  %v913_v26 = vsub.f32 %v1921_v42, %v912_v54  ;;  %v902_v55 = vand.u32 4294901760, %v901_v0  ;;  %v1982_v29 = vsub.f32 %v817_v33, %v1964_v16  ;;  %856 = vmatpush.msrb.mxu0 %v1964_v16 }
  0xbe   :  { %v932_v50 = vand.u32 4294901760, %v931_v21 }
  0xbf   :  { %v342_v30 = vadd.f32 %v341_v59, %v303_v27  ;;  %v924_v27 = vand.u32 4294901760, %v1958_v15  ;;  %v1972_v59 = vsub.f32 %v818_v2, %v1955_v34  ;;  %903 = vmatpush.msrb.mxu1 %v902_v55  ;;  %v914_v24 = vand.u32 4294901760, %v913_v26  ;;  %858 = vmatpush.msrb.mxu0 %v1974_v61  ;;  %v813_v26 = vld [vmem:[#allocation8] sm:$0xff] }
  0xc0   :  { %v942_v46 = vand.u32 4294901760, %v1982_v29 }
  0xc1   :  { %v925_v10 = vsub.f32 %v1958_v15, %v924_v27  ;;  %909 = vmatpush.msrb.mxu1 %v908_v6  ;;  %v863_v6 = vand.u32 4294901760, %v813_v26 }
  0xc2   :  { %v943_v2 = vsub.f32 %v1982_v29, %v942_v46 }
  0xc3   :  { %915 = vmatpush.msrb.mxu1 %v914_v24  ;;  %v965_v24 = vsub.f32 %v813_v26, %v863_v6 }
  0xc4   :  { %v944_v20 = vand.u32 4294901760, %v943_v2 }
  0xc5   :  { %921 = vmatpush.msrb.mxu1 %v920_v44  ;;  %v966_v44 = vand.u32 4294901760, %v965_v24 }
  0xd2   :  { %v410_v45 = vpop.f32.mrf.mxu0 }
  0xd3   :  { %v411_v53 = vadd.f32 %v410_v45, %v342_v30  ;;  %v936_v45 = vand.u32 4294901760, %v1972_v59 }
  0xd5   :  { %v937_v58 = vsub.f32 %v1972_v59, %v936_v45 }
  0xda   :  { %v447_v56 = vpop.f32.mrf.mxu1 }
  0xdb   :  { %v448_v8 = vadd.f32 %v447_v56, %v411_v53  ;;  %v1991_v53 = vsub.f32 %v816_v35, %v1974_v61  ;;  %v926_v56 = vand.u32 4294901760, %v925_v10  ;;  %v814_v35 = vld [vmem:[#allocation8 + $0x8] sm:$0xff] }
  0xdd   :  { %v450_v12 = vmax.f32 %v448_v8, 0.0  ;;  %v948_v52 = vand.u32 4294901760, %v1991_v53  ;;  %927 = vmatpush.msrb.mxu1 %v926_v56  ;;  %v938_v8 = vand.u32 4294901760, %v937_v58 }
  0xdf   :  { %v503_v18 = vand.u32 4294901760, %v450_v12  ;;  %v949_v33 = vsub.f32 %v1991_v53, %v948_v52  ;;  %933 = vmatpush.msrb.mxu1 %v932_v50 }
  0xe1   :  { %v504_v62 = vsub.f32 %v450_v12, %v503_v18  ;;  %609 = vmatmul.f32.vlgmr.msrb.gmra.mxu3 %v503_v18  ;;  %939 = vmatpush.msrb.mxu1 %v938_v8  ;;  %v950_v0 = vand.u32 4294901760, %v949_v33  ;;  %v815_v12 = vld [vmem:[#allocation8 + $0x10] sm:$0xff] }
  0xe2   :  { %1030 = vmatpush.msrb.mxu3 %v1880_v4  ;;  %v859_v32 = vand.u32 4294901760, %v815_v12 }
  0xe3   :  { %663 = vmatmul.f32.vlgmr.msra.gmra.mxu0 %v504_v62  ;;  %v505_v30 = vand.u32 4294901760, %v504_v62  ;;  %945 = vmatpush.msrb.mxu1 %v944_v20 }
  0xe4   :  { %1032 = vmatpush.msrb.mxu3 %v1882_v25  ;;  %v953_v36 = vsub.f32 %v815_v12, %v859_v32  ;;  %860 = vmatpush.msrb.mxu0 %v859_v32 }
  0xe5   :  { %702 = vmatmul.f32.vlgmr.msra.gmra.mxu1 %v505_v30  ;;  %v506_v5 = vsub.f32 %v504_v62, %v505_v30 }
  0xe6   :  { %1034 = vmatpush.msrb.mxu3 %v1884_v39  ;;  %951 = vmatpush.msrb.mxu1 %v950_v0  ;;  %v954_v55 = vand.u32 4294901760, %v953_v36 }
  0xe7   :  { %v507_v40 = vand.u32 4294901760, %v506_v5 }
  0xe8   :  { %1036 = vmatpush.msrb.mxu3 %v1886_v41  ;;  %v955_v7 = vsub.f32 %v953_v36, %v954_v55 }
  0xe9   :  { %508 = vmatmul.f32.vlgmr.msrb.gmra.mxu2 %v507_v40  ;;  %808 = vmatmul.f32.vlgmr.msra.gmra.mxu3 %v503_v18  ;;  %v967_v40 = vsub.f32 %v965_v24, %v966_v44 }
  0xea   :  { %977 = vmatpush.msrb.mxu2 %v1893_v57  ;;  %1038 = vmatpush.msrb.mxu3 %v1888_v9  ;;  %v956_v10 = vand.u32 4294901760, %v955_v7 }
  0xeb   :  { %v968_v56 = vand.u32 4294901760, %v967_v40 }
  0xec   :  { %980 = vmatpush.msrb.mxu2 %v1896_v19  ;;  %1040 = vmatpush.msrb.mxu3 %v1890_v43 }
  0xed   :  { %957 = vmatpush.msrb.mxu1 %v956_v10 }
  0xee   :  { %983 = vmatpush.msrb.mxu2 %v1899_v11  ;;  %1042 = vmatpush.msrb.mxu3 %v1902_v51 }
  0xf0   :  { %986 = vmatpush.msrb.mxu2 %v1905_v37  ;;  %1044 = vmatpush.msrb.mxu3 %v1913_v48 }
  0xf1   :  { %771 = vmatmul.f32.vlgmr.msra.gmra.mxu2 %v503_v18  ;;  %v861_v18 = vand.u32 4294901760, %v814_v35 }
  0xf2   :  { %989 = vmatpush.msrb.mxu2 %v1908_v17  ;;  %1046 = vmatpush.msrb.mxu3 %v1947_v60 }
  0xf3   :  { %v959_v62 = vsub.f32 %v814_v35, %v861_v18  ;;  %862 = vmatpush.msrb.mxu0 %v861_v18 }
  0xf4   :  { %992 = vmatpush.msrb.mxu2 %v1911_v38  ;;  %1048 = vmatpush.msrb.mxu3 %v1949_v31 }
  0xf5   :  { %v960_v30 = vand.u32 4294901760, %v959_v62  ;;  %864 = vmatpush.msrb.mxu0 %v863_v6 }
  0xf6   :  { %995 = vmatpush.msrb.mxu2 %v1921_v42  ;;  %1050 = vmatpush.msrb.mxu3 %v1955_v34 }
  0xf7   :  { %1071 = vmatpush.msra.mxu0 %v876_v22  ;;  %v961_v5 = vsub.f32 %v959_v62, %v960_v30 }
  0xf8   :  { %998 = vmatpush.msrb.mxu2 %v1936_v28  ;;  %1052 = vmatpush.msrb.mxu3 %v1964_v16 }
  0xf9   :  { %1075 = vmatpush.msra.mxu0 %v882_v47  ;;  %v962_v21 = vand.u32 4294901760, %v961_v5 }
  0xfa   :  { %1001 = vmatpush.msrb.mxu2 %v1958_v15  ;;  %1054 = vmatpush.msrb.mxu3 %v1974_v61 }
  0xfb   :  { %1079 = vmatpush.msra.mxu0 %v888_v14  ;;  %963 = vmatpush.msrb.mxu1 %v962_v21 }
  0xfc   :  { %1004 = vmatpush.msrb.mxu2 %v1962_v23  ;;  %1056 = vmatpush.msrb.mxu3 %v859_v32 }
  0xfd   :  { %1083 = vmatpush.msra.mxu0 %v894_v3  ;;  %969 = vmatpush.msrb.mxu1 %v968_v56 }
  0xfe   :  { %1007 = vmatpush.msrb.mxu2 %v1972_v59  ;;  %1058 = vmatpush.msrb.mxu3 %v861_v18 }
  0xff   :  { %1138 = vmatpush.msra.mxu1 %v1880_v4  ;;  %1087 = vmatpush.msra.mxu0 %v900_v49  ;;  %v1202_v4 = vld [vmem:[%s2088_s4] ss:$0 sm:$0xff] }
 0x100   :  { %1010 = vmatpush.msrb.mxu2 %v1982_v29  ;;  %1060 = vmatpush.msrb.mxu3 %v863_v6  ;;  %v1203_v49 = vld [vmem:[%s2090_s6] ss:$0 sm:$0xff] }
 0x101   :  { %1140 = vmatpush.msra.mxu1 %v1882_v25  ;;  %1091 = vmatpush.msra.mxu0 %v906_v63 }
 0x102   :  { %1013 = vmatpush.msrb.mxu2 %v1991_v53 }
 0x103   :  { %1142 = vmatpush.msra.mxu1 %v1884_v39  ;;  %1095 = vmatpush.msra.mxu0 %v912_v54 }
 0x104   :  { %1016 = vmatpush.msrb.mxu2 %v953_v36 }
 0x105   :  { %1144 = vmatpush.msra.mxu1 %v1886_v41  ;;  %1099 = vmatpush.msra.mxu0 %v918_v1 }
 0x106   :  { %1019 = vmatpush.msrb.mxu2 %v959_v62 }
 0x107   :  { %1146 = vmatpush.msra.mxu1 %v1888_v9  ;;  %1103 = vmatpush.msra.mxu0 %v924_v27 }
 0x108   :  { %1022 = vmatpush.msrb.mxu2 %v965_v24 }
 0x109   :  { %1148 = vmatpush.msra.mxu1 %v1890_v43  ;;  %1107 = vmatpush.msra.mxu0 %v930_v13 }
 0x10b   :  { %1150 = vmatpush.msra.mxu1 %v1902_v51  ;;  %1111 = vmatpush.msra.mxu0 %v936_v45 }
 0x10d   :  { %1152 = vmatpush.msra.mxu1 %v1913_v48  ;;  %1115 = vmatpush.msra.mxu0 %v942_v46 }
 0x10f   :  { %1154 = vmatpush.msra.mxu1 %v1947_v60  ;;  %1119 = vmatpush.msra.mxu0 %v948_v52 }
 0x111   :  { %1156 = vmatpush.msra.mxu1 %v1949_v31  ;;  %1123 = vmatpush.msra.mxu0 %v954_v55 }
 0x113   :  { %1158 = vmatpush.msra.mxu1 %v1955_v34  ;;  %1127 = vmatpush.msra.mxu0 %v960_v30 }
 0x115   :  { %1160 = vmatpush.msra.mxu1 %v1964_v16  ;;  %1131 = vmatpush.msra.mxu0 %v966_v44 }
 0x117   :  { %1162 = vmatpush.msra.mxu1 %v1974_v61 }
 0x119   :  { %1164 = vmatpush.msra.mxu1 %v859_v32 }
 0x11b   :  { %1166 = vmatpush.msra.mxu1 %v861_v18 }
 0x11d   :  { %1168 = vmatpush.msra.mxu1 %v863_v6 }
 0x160   :  { %v664_v43 = vpop.f32.mrf.mxu0 }
 0x162   :  { %v703_v19 = vpop.f32.mrf.mxu1 }
 0x164   :  { %v610_v25 = vpop.f32.mrf.mxu3 }
 0x16c   :  { %v509_v39 = vpop.f32.mrf.mxu2  ;;  %v809_v17 = vpop.f32.mrf.mxu3 }
 0x16d   :  { %v510_v41 = vadd.f32 %v1202_v4, %v509_v39 }
 0x16f   :  { %v611_v9 = vadd.f32 %v610_v25, %v510_v41 }
 0x171   :  { %v665_v57 = vadd.f32 %v664_v43, %v611_v9 }
 0x173   :  { %v704_v11 = vadd.f32 %v703_v19, %v665_v57 }
 0x174   :  { %v772_v51 = vpop.f32.mrf.mxu2 }
 0x175   :  { %v773_v37 = vadd.f32 %v772_v51, %v704_v11 }
 0x177   :  { %v810_v38 = vadd.f32 %v809_v17, %v773_v37 }
 0x179   :  { %v812_v48 = vmax.f32 %v810_v38, 0.0 }
 0x17b   :  { %v865_v22 = vand.u32 4294901760, %v812_v48 }
 0x17d   :  { %v866_v47 = vsub.f32 %v812_v48, %v865_v22  ;;  %971 = vmatmul.f32.vlgmr.msrb.gmra.mxu1 %v865_v22 }
 0x17f   :  { %1025 = vmatmul.f32.vlgmr.msrb.gmra.mxu2 %v866_v47  ;;  %v867_v14 = vand.u32 4294901760, %v866_v47 }
 0x181   :  { %1064 = vmatmul.f32.vlgmr.msrb.gmra.mxu3 %v867_v14  ;;  %v868_v3 = vsub.f32 %v866_v47, %v867_v14 }
 0x183   :  { %v869_v42 = vand.u32 4294901760, %v868_v3 }
 0x185   :  { %870 = vmatmul.f32.vlgmr.msrb.gmra.mxu0 %v869_v42  ;;  %1170 = vmatmul.f32.vlgmr.msra.gmra.mxu1 %v865_v22 }
 0x18d   :  { %1133 = vmatmul.f32.vlgmr.msra.gmra.mxu0 %v865_v22 }
 0x1fa   :  { %v972_v63 = vpop.f32.mrf.mxu1 }
 0x202   :  { %v871_v28 = vpop.f32.mrf.mxu0  ;;  %v1026_v31 = vpop.f32.mrf.mxu2 }
 0x203   :  { %v872_v54 = vadd.f32 %v1203_v49, %v871_v28  ;;  %v1171_v27 = vpop.f32.mrf.mxu1 }
 0x204   :  { %v1065_v34 = vpop.f32.mrf.mxu3 }
 0x205   :  { %v973_v60 = vadd.f32 %v972_v63, %v872_v54 }
 0x207   :  { %v1027_v1 = vadd.f32 %v1026_v31, %v973_v60 }
 0x209   :  { %v1066_v15 = vadd.f32 %v1065_v34, %v1027_v1 }
 0x20a   :  { %v1134_v23 = vpop.f32.mrf.mxu0 }
 0x20b   :  { %v1135_v16 = vadd.f32 %v1134_v23, %v1066_v15 }
 0x20d   :  { %v1172_v59 = vadd.f32 %v1171_v27, %v1135_v16 }
 0x20f   :  { %1174 = vst [vmem:[#allocation10] sm:$0xff] %v1172_v59 }
 0x210   :  { %1185 = dma.vmem_to_hbm [thread:$0]  %s1181_s24, 128, %s1183_s27, [#allocation4]  }
 0x211   :  { %1330 = dma.done.wait [#allocation4], 128  }
 0x212   :  { %1331 = vsyncadd [#allocation4], 4294967168 }
 0x213   :  { %1190 = vsyncpa [#allocation3], 1 }
 0x214   :  { %1191 = vsyncpa [#allocation6], 1 }
 0x215   :  { %1192 = vsyncpa [#allocation9], 1 }
 0x216   :  { %1193 = vsyncpa [#allocation4], 1 }

</bundles_post_ra>
